<compile_context>
chip_gen: v5e
topology: v5e:2x2
jax: 0.10.0
libtpu: 0.0.40
codegen_flags: <defaults>
</compile_context>

<pallas_src>
import functools

import jax
import jax.numpy as jnp
import numpy as np
from jax.experimental import pallas as pl
from jax.experimental.pallas import tpu as pltpu

LANE = 128


def _round_up(n, m):
    return ((n + m - 1) // m) * m


# ----------------------------- Pallas kernels ------------------------------ #

def _wsconv_kernel(x_ref, w_ref, b_ref, o_ref, *, kh, kw, wp, neg_slope):
    # x_ref: (1, Hp*Wp + kw-1, Cp)  flattened spatially-padded input (one batch element)
    #        (kw-1 zero guard rows appended so the last tap's shifted slab stays in-bounds)
    # w_ref: (kh*kw, Cp, Cop)       pre-scaled, channel-padded weights (flattened taps)
    # b_ref: (1, Cop)               channel-padded bias
    # o_ref: (1, Ho*Wp, Cop)        conv output over the full padded width Wp
    #                               (columns >= Wo are junk; the wrapper slices them off)
    m = o_ref.shape[1]              # Ho * Wp
    cop = o_ref.shape[-1]
    acc = jnp.zeros((m, cop), jnp.float32)
    for i in range(kh):
        for j in range(kw):
            slab = x_ref[0, i * wp + j: i * wp + j + m, :]          # (Ho*Wp, Cp)
            acc = acc + jnp.dot(slab, w_ref[i * kw + j],
                                preferred_element_type=jnp.float32)
    acc = acc + b_ref[...]
    if neg_slope is not None:
        acc = jnp.where(acc >= 0, acc, neg_slope * acc)
    o_ref[0] = acc.astype(o_ref.dtype)


def _wsconv_pool_kernel(x_ref, w_ref, b_ref, p_ref, o_ref, *, kh, kw, wp, m, neg_slope):
    # Fused conv + bias + LeakyReLU + 2x2/stride-2 avg-pool.
    # p_ref: (H2*W2, Ho*Wp) pooling matrix (0.25 at the 4 contributing positions per row;
    #        it only selects valid columns, so the junk columns w >= Wo never leak through)
    # o_ref: (1, H2*W2, Cop)
    cop = o_ref.shape[-1]
    acc = jnp.zeros((m, cop), jnp.float32)
    for i in range(kh):
        for j in range(kw):
            slab = x_ref[0, i * wp + j: i * wp + j + m, :]          # (Ho*Wp, Cp)
            acc = acc + jnp.dot(slab, w_ref[i * kw + j],
                                preferred_element_type=jnp.float32)
    acc = acc + b_ref[...]
    acc = jnp.where(acc >= 0, acc, neg_slope * acc)
    pooled = jnp.dot(p_ref[...], acc, preferred_element_type=jnp.float32)
    o_ref[0] = pooled.astype(o_ref.dtype)


def _mb_std_kernel(x_ref, o_ref):
    # x_ref: (B, H, W, C) full (un-padded) tensor in VMEM; o_ref: (1, 1) scalar in SMEM
    x = x_ref[...].astype(jnp.float32)
    b = x.shape[0]
    mean = jnp.sum(x, axis=0, keepdims=True) / b
    var = jnp.sum((x - mean) ** 2, axis=0) / (b - 1)   # torch.std is unbiased (ddof=1); needs B > 1
    o_ref[0, 0] = jnp.mean(jnp.sqrt(var))


# ------------------------------ wrappers ----------------------------------- #

def _prep_weights(w_oihw, bias, cin_present, cout_pad):
    """Equalized-LR scale + HWIO transpose + flatten taps + zero-pad channels."""
    cout, cin_real, kh, kw = w_oihw.shape
    scale = (2.0 / (kh * kw * cin_real)) ** 0.5          # He std (uses the TRUE fan-in)
    w = jnp.transpose(w_oihw * scale, (2, 3, 1, 0)).reshape(kh * kw, cin_real, cout)
    w = jnp.pad(w, ((0, 0), (0, cin_present - cin_real), (0, cout_pad - cout)))
    b = jnp.pad(bias, (0, cout_pad - cout)).reshape(1, cout_pad)
    return w, b


def _flatten_padded_input(x_nhwc, padding, kw):
    B, H, W, Cp = x_nhwc.shape
    xp = jnp.pad(x_nhwc, ((0, 0), (padding, padding), (padding, padding), (0, 0)))
    Hp, Wp = H + 2 * padding, W + 2 * padding
    xf = xp.reshape(B, Hp * Wp, Cp)
    if kw > 1:                                           # guard rows for the last tap's slab
        xf = jnp.pad(xf, ((0, 0), (0, kw - 1), (0, 0)))
    return xf, Hp, Wp


def wscaled_conv_pallas(x_nhwc, w_oihw, bias, *, padding, neg_slope=None):
    """x_nhwc carries channel-padded (multiple of 128) channels; returns NHWC, still padded."""
    B, H, W, Cp = x_nhwc.shape
    Cout, Cin_real, KH, KW = w_oihw.shape
    assert Cin_real <= Cp
    Cop = _round_up(Cout, LANE)
    w_flat, b_pad = _prep_weights(w_oihw, bias, Cp, Cop)
    xf, Hp, Wp = _flatten_padded_input(x_nhwc, padding, KW)
    Ho, Wo = Hp - KH + 1, Wp - KW + 1
    M = Ho * Wp
    Lf = xf.shape[1]

    kern = functools.partial(_wsconv_kernel, kh=KH, kw=KW, wp=Wp, neg_slope=neg_slope)
    out = pl.pallas_call(
        kern,
        out_shape=jax.ShapeDtypeStruct((B, M, Cop), x_nhwc.dtype),
        grid=(B,),
        in_specs=[
            pl.BlockSpec((1, Lf, Cp), lambda b: (b, 0, 0)),
            pl.BlockSpec((KH * KW, Cp, Cop), lambda b: (0, 0, 0)),
            pl.BlockSpec((1, Cop), lambda b: (0, 0)),
        ],
        out_specs=pl.BlockSpec((1, M, Cop), lambda b: (b, 0, 0)),
        compiler_params=pltpu.CompilerParams(dimension_semantics=("parallel",)),
    )(xf, w_flat, b_pad)
    # Drop the junk columns (w >= Wo) introduced by computing over the full padded width.
    return out.reshape(B, Ho, Wp, Cop)[:, :, :Wo, :]


def wscaled_conv_pool_pallas(x_nhwc, w_oihw, bias, *, padding, neg_slope):
    """Fused conv + bias + LeakyReLU + 2x2/stride-2 avg-pool (non-initial Dblock tail)."""
    B, H, W, Cp = x_nhwc.shape
    Cout, Cin_real, KH, KW = w_oihw.shape
    assert Cin_real <= Cp
    Cop = _round_up(Cout, LANE)
    w_flat, b_pad = _prep_weights(w_oihw, bias, Cp, Cop)
    xf, Hp, Wp = _flatten_padded_input(x_nhwc, padding, KW)
    Ho, Wo = Hp - KH + 1, Wp - KW + 1
    assert Ho % 2 == 0 and Wo % 2 == 0
    H2, W2 = Ho // 2, Wo // 2
    M = Ho * Wp
    Lf = xf.shape[1]

    # 2x2/stride-2 average pool expressed as one (H2*W2, Ho*Wp) matmul over the flat conv plane.
    pm = np.zeros((H2 * W2, M), np.float32)
    for ph in range(H2):
        for pw in range(W2):
            r = ph * W2 + pw
            for di in range(2):
                for dj in range(2):
                    pm[r, (2 * ph + di) * Wp + (2 * pw + dj)] = 0.25
    pmat = jnp.asarray(pm)

    kern = functools.partial(_wsconv_pool_kernel, kh=KH, kw=KW, wp=Wp, m=M,
                             neg_slope=neg_slope)
    out = pl.pallas_call(
        kern,
        out_shape=jax.ShapeDtypeStruct((B, H2 * W2, Cop), x_nhwc.dtype),
        grid=(B,),
        in_specs=[
            pl.BlockSpec((1, Lf, Cp), lambda b: (b, 0, 0)),
            pl.BlockSpec((KH * KW, Cp, Cop), lambda b: (0, 0, 0)),
            pl.BlockSpec((1, Cop), lambda b: (0, 0)),
            pl.BlockSpec((H2 * W2, M), lambda b: (0, 0)),
        ],
        out_specs=pl.BlockSpec((1, H2 * W2, Cop), lambda b: (b, 0, 0)),
        compiler_params=pltpu.CompilerParams(dimension_semantics=("parallel",)),
    )(xf, w_flat, b_pad, pmat)
    return out.reshape(B, H2, W2, Cop)


def minibatch_std_scalar_pallas(x_nhwc):
    """Scalar mean of per-position unbiased std over the batch (computed on the REAL channels)."""
    return pl.pallas_call(
        _mb_std_kernel,
        out_shape=jax.ShapeDtypeStruct((1, 1), jnp.float32),
        in_specs=[pl.BlockSpec(memory_space=pltpu.MemorySpace.VMEM)],
        out_specs=pl.BlockSpec(memory_space=pltpu.MemorySpace.SMEM),
    )(x_nhwc)[0, 0]


# ------------------------------ Dblock ------------------------------------- #

def init_dblock(key, *, initial, ins, outs):
    eff_ins = ins + 1 if initial else ins
    k1, k2, k3 = jax.random.split(key, 3)
    params = {
        "w1": jax.random.normal(k1, (outs, eff_ins, 3, 3), jnp.float32),
        "b1": jnp.zeros((outs,), jnp.float32),
    }
    if initial:
        params["w2"] = jax.random.normal(k2, (outs, outs, 4, 4), jnp.float32)
        params["b2"] = jnp.zeros((outs,), jnp.float32)
        params["w3"] = jax.random.normal(k3, (1, outs, 1, 1), jnp.float32)
        params["b3"] = jnp.zeros((1,), jnp.float32)
    else:
        params["w2"] = jax.random.normal(k2, (outs, outs, 3, 3), jnp.float32)
        params["b2"] = jnp.zeros((outs,), jnp.float32)
    return params


def dblock_forward(params, x_nchw, *, initial, b_size):
    # x_nchw: PyTorch-style (B, C, H, W) input
    x = jnp.transpose(x_nchw, (0, 2, 3, 1))            # -> NHWC for the kernels
    B, H, W, _ = x.shape
    if initial:
        # TODO(synk): folding the std channel into the bias is NOT exact under zero padding
        # (border pixels see fewer std taps), so keep the explicit concat for exact parity.
        s = minibatch_std_scalar_pallas(x)
        x = jnp.concatenate(
            [x, jnp.broadcast_to(s.astype(x.dtype), (B, H, W, 1))], axis=-1)
    # Pad channels to the 128-lane width once; zero pad-channels stay exactly zero through
    # every conv (zero weights / zero bias / lrelu(0)=0), so all kernel loads and stores are
    # lane-dense. Real channels are sliced back out at the very end.
    cp = _round_up(x.shape[-1], LANE)
    x = jnp.pad(x, ((0, 0), (0, 0), (0, 0), (0, cp - x.shape[-1])))

    x = wscaled_conv_pallas(x, params["w1"], params["b1"], padding=1, neg_slope=0.2)
    if initial:
        x = wscaled_conv_pallas(x, params["w2"], params["b2"], padding=0, neg_slope=0.2)
        x = wscaled_conv_pallas(x, params["w3"], params["b3"], padding=0, neg_slope=None)
        x = x[..., :params["w3"].shape[0]]              # drop padded channels
        return jnp.transpose(x, (0, 3, 1, 2)).reshape(b_size, -1)
    # Fused conv2 + LeakyReLU + 2x2 avg-pool (no HBM round-trip of the full-res conv2 output).
    x = wscaled_conv_pool_pallas(x, params["w2"], params["b2"], padding=1, neg_slope=0.2)
    x = x[..., :params["w2"].shape[0]]                  # drop padded channels
    return jnp.transpose(x, (0, 3, 1, 2))               # back to NCHW


# --------------------------- plain-JAX reference ---------------------------- #

def _ref_conv(x_nhwc, w_oihw, bias, padding, neg_slope):
    Cout, Cin, KH, KW = w_oihw.shape
    scale = (2.0 / (KH * KW * Cin)) ** 0.5
    w = jnp.transpose(w_oihw * scale, (2, 3, 1, 0))
    y = jax.lax.conv_general_dilated(x_nhwc, w, (1, 1),
                                     [(padding, padding)] * 2,
                                     dimension_numbers=("NHWC", "HWIO", "NHWC"))
    y = y + bias
    if neg_slope is not None:
        y = jnp.where(y >= 0, y, neg_slope * y)
    return y


def ref_forward(params, x_nchw, *, initial, b_size):
    x = jnp.transpose(x_nchw, (0, 2, 3, 1))
    if initial:
        std = jnp.std(x, axis=0, ddof=1)
        ms = jnp.mean(std)
        x = jnp.concatenate([x, jnp.broadcast_to(ms, x.shape[:-1] + (1,))], axis=-1)
    x = _ref_conv(x, params["w1"], params["b1"], 1, 0.2)
    if initial:
        x = _ref_conv(x, params["w2"], params["b2"], 0, 0.2)
        x = _ref_conv(x, params["w3"], params["b3"], 0, None)
        return jnp.transpose(x, (0, 3, 1, 2)).reshape(b_size, -1)
    x = _ref_conv(x, params["w2"], params["b2"], 1, 0.2)
    B, H, W, C = x.shape
    x = x.reshape(B, H // 2, 2, W // 2, 2, C).mean(axis=(2, 4))
    return jnp.transpose(x, (0, 3, 1, 2))


# --------------------------------- main ------------------------------------ #

if __name__ == "__main__":
    key = jax.random.PRNGKey(0)
    kx1, kx2, kp1, kp2 = jax.random.split(key, 4)

    # Non-initial Dblock: conv3x3 -> lrelu -> [conv3x3 -> lrelu -> avgpool 2x2] (fused)
    B, Cin, H, W, Cout = 2, 4, 16, 16, 8
    x1 = jax.random.normal(kx1, (B, Cin, H, W), jnp.float32)
    p1 = init_dblock(kp1, initial=False, ins=Cin, outs=Cout)
    out1 = dblock_forward(p1, x1, initial=False, b_size=B)
    jax.block_until_ready(out1)
    ref1 = ref_forward(p1, x1, initial=False, b_size=B)
    np.testing.assert_allclose(np.asarray(out1), np.asarray(ref1), rtol=2e-4, atol=2e-4)
    assert out1.shape == (B, Cout, H // 2, W // 2)

    # Initial Dblock: minibatch-std -> conv3x3 -> conv4x4 -> conv1x1 -> view(b, -1)
    Bi, Ci, Hi, Wi, Co_i = 2, 4, 4, 4, 8
    x2 = jax.random.normal(kx2, (Bi, Ci, Hi, Wi), jnp.float32)
    p2 = init_dblock(kp2, initial=True, ins=Ci, outs=Co_i)
    out2 = dblock_forward(p2, x2, initial=True, b_size=Bi)
    jax.block_until_ready(out2)
    ref2 = ref_forward(p2, x2, initial=True, b_size=Bi)
    np.testing.assert_allclose(np.asarray(out2), np.asarray(ref2), rtol=2e-4, atol=2e-4)
    assert out2.shape == (Bi, 1)

    print("KERNEL_OK")
</pallas_src>

<mosaic_0001>
module attributes {stable_mosaic.version = 11 : i64} {
  func.func @_wsconv_kernel(%arg0: i32, %arg1: memref<1x326x128xf32, #tpu.memory_space<vmem>>, %arg2: memref<9x128x128xf32, #tpu.memory_space<vmem>>, %arg3: memref<1x128xf32, #tpu.memory_space<vmem>>, %arg4: memref<1x288x128xf32, #tpu.memory_space<vmem>>) attributes {dimension_semantics = [#tpu.dimension_semantics<parallel>], iteration_bounds = array<i64: 2>, scalar_prefetch = 0 : i64, scratch_operands = 0 : i64, tpu.core_type = #tpu.core_type<tc>, window_params = [{transform_indices = @transform_0, window_bounds = array<i64: 1, 326, 128>}, {pipeline_mode = #tpu.pipeline_mode<synchronous>, transform_indices = @transform_1, window_bounds = array<i64: 9, 128, 128>}, {pipeline_mode = #tpu.pipeline_mode<synchronous>, transform_indices = @transform_2, window_bounds = array<i64: 1, 128>}, {transform_indices = @transform_3, window_bounds = array<i64: 1, 288, 128>}]} {
    %cst = arith.constant 0.000000e+00 : f32
    %0 = vector.broadcast %cst : f32 to vector<288x128xf32>
    %c0 = arith.constant 0 : index
    %c0_0 = arith.constant 0 : index
    %c0_1 = arith.constant 0 : index
    %1 = vector.load %arg1[%c0, %c0_0, %c0_1] : memref<1x326x128xf32, #tpu.memory_space<vmem>>, vector<1x288x128xf32>
    %2 = vector.shape_cast %1 : vector<1x288x128xf32> to vector<288x128xf32>
    %c0_2 = arith.constant 0 : index
    %c0_3 = arith.constant 0 : index
    %c0_4 = arith.constant 0 : index
    %3 = vector.load %arg2[%c0_2, %c0_3, %c0_4] : memref<9x128x128xf32, #tpu.memory_space<vmem>>, vector<1x128x128xf32>
    %4 = vector.shape_cast %3 : vector<1x128x128xf32> to vector<128x128xf32>
    %cst_5 = arith.constant dense<0.000000e+00> : vector<288x128xf32>
    %5 = tpu.matmul %2, %4, %cst_5 {dimension_numbers = #tpu.dot_dimension_numbers<[1], [0], [0], [1], [0, 0, 1, 1], [], []>} : vector<288x128xf32>, vector<128x128xf32>, vector<288x128xf32> -> vector<288x128xf32>
    %6 = arith.addf %0, %5 : vector<288x128xf32>
    %c0_6 = arith.constant 0 : index
    %c1 = arith.constant 1 : index
    %c0_7 = arith.constant 0 : index
    %7 = vector.load %arg1[%c0_6, %c1, %c0_7] : memref<1x326x128xf32, #tpu.memory_space<vmem>>, vector<1x288x128xf32>
    %8 = vector.shape_cast %7 : vector<1x288x128xf32> to vector<288x128xf32>
    %c1_8 = arith.constant 1 : index
    %c0_9 = arith.constant 0 : index
    %c0_10 = arith.constant 0 : index
    %9 = vector.load %arg2[%c1_8, %c0_9, %c0_10] : memref<9x128x128xf32, #tpu.memory_space<vmem>>, vector<1x128x128xf32>
    %10 = vector.shape_cast %9 : vector<1x128x128xf32> to vector<128x128xf32>
    %cst_11 = arith.constant dense<0.000000e+00> : vector<288x128xf32>
    %11 = tpu.matmul %8, %10, %cst_11 {dimension_numbers = #tpu.dot_dimension_numbers<[1], [0], [0], [1], [0, 0, 1, 1], [], []>} : vector<288x128xf32>, vector<128x128xf32>, vector<288x128xf32> -> vector<288x128xf32>
    %12 = arith.addf %6, %11 : vector<288x128xf32>
    %c0_12 = arith.constant 0 : index
    %c2 = arith.constant 2 : index
    %c0_13 = arith.constant 0 : index
    %13 = vector.load %arg1[%c0_12, %c2, %c0_13] : memref<1x326x128xf32, #tpu.memory_space<vmem>>, vector<1x288x128xf32>
    %14 = vector.shape_cast %13 : vector<1x288x128xf32> to vector<288x128xf32>
    %c2_14 = arith.constant 2 : index
    %c0_15 = arith.constant 0 : index
    %c0_16 = arith.constant 0 : index
    %15 = vector.load %arg2[%c2_14, %c0_15, %c0_16] : memref<9x128x128xf32, #tpu.memory_space<vmem>>, vector<1x128x128xf32>
    %16 = vector.shape_cast %15 : vector<1x128x128xf32> to vector<128x128xf32>
    %cst_17 = arith.constant dense<0.000000e+00> : vector<288x128xf32>
    %17 = tpu.matmul %14, %16, %cst_17 {dimension_numbers = #tpu.dot_dimension_numbers<[1], [0], [0], [1], [0, 0, 1, 1], [], []>} : vector<288x128xf32>, vector<128x128xf32>, vector<288x128xf32> -> vector<288x128xf32>
    %18 = arith.addf %12, %17 : vector<288x128xf32>
    %c0_18 = arith.constant 0 : index
    %c18 = arith.constant 18 : index
    %c0_19 = arith.constant 0 : index
    %19 = vector.load %arg1[%c0_18, %c18, %c0_19] : memref<1x326x128xf32, #tpu.memory_space<vmem>>, vector<1x288x128xf32>
    %20 = vector.shape_cast %19 : vector<1x288x128xf32> to vector<288x128xf32>
    %c3 = arith.constant 3 : index
    %c0_20 = arith.constant 0 : index
    %c0_21 = arith.constant 0 : index
    %21 = vector.load %arg2[%c3, %c0_20, %c0_21] : memref<9x128x128xf32, #tpu.memory_space<vmem>>, vector<1x128x128xf32>
    %22 = vector.shape_cast %21 : vector<1x128x128xf32> to vector<128x128xf32>
    %cst_22 = arith.constant dense<0.000000e+00> : vector<288x128xf32>
    %23 = tpu.matmul %20, %22, %cst_22 {dimension_numbers = #tpu.dot_dimension_numbers<[1], [0], [0], [1], [0, 0, 1, 1], [], []>} : vector<288x128xf32>, vector<128x128xf32>, vector<288x128xf32> -> vector<288x128xf32>
    %24 = arith.addf %18, %23 : vector<288x128xf32>
    %c0_23 = arith.constant 0 : index
    %c19 = arith.constant 19 : index
    %c0_24 = arith.constant 0 : index
    %25 = vector.load %arg1[%c0_23, %c19, %c0_24] : memref<1x326x128xf32, #tpu.memory_space<vmem>>, vector<1x288x128xf32>
    %26 = vector.shape_cast %25 : vector<1x288x128xf32> to vector<288x128xf32>
    %c4 = arith.constant 4 : index
    %c0_25 = arith.constant 0 : index
    %c0_26 = arith.constant 0 : index
    %27 = vector.load %arg2[%c4, %c0_25, %c0_26] : memref<9x128x128xf32, #tpu.memory_space<vmem>>, vector<1x128x128xf32>
    %28 = vector.shape_cast %27 : vector<1x128x128xf32> to vector<128x128xf32>
    %cst_27 = arith.constant dense<0.000000e+00> : vector<288x128xf32>
    %29 = tpu.matmul %26, %28, %cst_27 {dimension_numbers = #tpu.dot_dimension_numbers<[1], [0], [0], [1], [0, 0, 1, 1], [], []>} : vector<288x128xf32>, vector<128x128xf32>, vector<288x128xf32> -> vector<288x128xf32>
    %30 = arith.addf %24, %29 : vector<288x128xf32>
    %c0_28 = arith.constant 0 : index
    %c20 = arith.constant 20 : index
    %c0_29 = arith.constant 0 : index
    %31 = vector.load %arg1[%c0_28, %c20, %c0_29] : memref<1x326x128xf32, #tpu.memory_space<vmem>>, vector<1x288x128xf32>
    %32 = vector.shape_cast %31 : vector<1x288x128xf32> to vector<288x128xf32>
    %c5 = arith.constant 5 : index
    %c0_30 = arith.constant 0 : index
    %c0_31 = arith.constant 0 : index
    %33 = vector.load %arg2[%c5, %c0_30, %c0_31] : memref<9x128x128xf32, #tpu.memory_space<vmem>>, vector<1x128x128xf32>
    %34 = vector.shape_cast %33 : vector<1x128x128xf32> to vector<128x128xf32>
    %cst_32 = arith.constant dense<0.000000e+00> : vector<288x128xf32>
    %35 = tpu.matmul %32, %34, %cst_32 {dimension_numbers = #tpu.dot_dimension_numbers<[1], [0], [0], [1], [0, 0, 1, 1], [], []>} : vector<288x128xf32>, vector<128x128xf32>, vector<288x128xf32> -> vector<288x128xf32>
    %36 = arith.addf %30, %35 : vector<288x128xf32>
    %c0_33 = arith.constant 0 : index
    %c36 = arith.constant 36 : index
    %c0_34 = arith.constant 0 : index
    %37 = vector.load %arg1[%c0_33, %c36, %c0_34] : memref<1x326x128xf32, #tpu.memory_space<vmem>>, vector<1x288x128xf32>
    %38 = vector.shape_cast %37 : vector<1x288x128xf32> to vector<288x128xf32>
    %c6 = arith.constant 6 : index
    %c0_35 = arith.constant 0 : index
    %c0_36 = arith.constant 0 : index
    %39 = vector.load %arg2[%c6, %c0_35, %c0_36] : memref<9x128x128xf32, #tpu.memory_space<vmem>>, vector<1x128x128xf32>
    %40 = vector.shape_cast %39 : vector<1x128x128xf32> to vector<128x128xf32>
    %cst_37 = arith.constant dense<0.000000e+00> : vector<288x128xf32>
    %41 = tpu.matmul %38, %40, %cst_37 {dimension_numbers = #tpu.dot_dimension_numbers<[1], [0], [0], [1], [0, 0, 1, 1], [], []>} : vector<288x128xf32>, vector<128x128xf32>, vector<288x128xf32> -> vector<288x128xf32>
    %42 = arith.addf %36, %41 : vector<288x128xf32>
    %c0_38 = arith.constant 0 : index
    %c37 = arith.constant 37 : index
    %c0_39 = arith.constant 0 : index
    %43 = vector.load %arg1[%c0_38, %c37, %c0_39] : memref<1x326x128xf32, #tpu.memory_space<vmem>>, vector<1x288x128xf32>
    %44 = vector.shape_cast %43 : vector<1x288x128xf32> to vector<288x128xf32>
    %c7 = arith.constant 7 : index
    %c0_40 = arith.constant 0 : index
    %c0_41 = arith.constant 0 : index
    %45 = vector.load %arg2[%c7, %c0_40, %c0_41] : memref<9x128x128xf32, #tpu.memory_space<vmem>>, vector<1x128x128xf32>
    %46 = vector.shape_cast %45 : vector<1x128x128xf32> to vector<128x128xf32>
    %cst_42 = arith.constant dense<0.000000e+00> : vector<288x128xf32>
    %47 = tpu.matmul %44, %46, %cst_42 {dimension_numbers = #tpu.dot_dimension_numbers<[1], [0], [0], [1], [0, 0, 1, 1], [], []>} : vector<288x128xf32>, vector<128x128xf32>, vector<288x128xf32> -> vector<288x128xf32>
    %48 = arith.addf %42, %47 : vector<288x128xf32>
    %c0_43 = arith.constant 0 : index
    %c38 = arith.constant 38 : index
    %c0_44 = arith.constant 0 : index
    %49 = vector.load %arg1[%c0_43, %c38, %c0_44] : memref<1x326x128xf32, #tpu.memory_space<vmem>>, vector<1x288x128xf32>
    %50 = vector.shape_cast %49 : vector<1x288x128xf32> to vector<288x128xf32>
    %c8 = arith.constant 8 : index
    %c0_45 = arith.constant 0 : index
    %c0_46 = arith.constant 0 : index
    %51 = vector.load %arg2[%c8, %c0_45, %c0_46] : memref<9x128x128xf32, #tpu.memory_space<vmem>>, vector<1x128x128xf32>
    %52 = vector.shape_cast %51 : vector<1x128x128xf32> to vector<128x128xf32>
    %cst_47 = arith.constant dense<0.000000e+00> : vector<288x128xf32>
    %53 = tpu.matmul %50, %52, %cst_47 {dimension_numbers = #tpu.dot_dimension_numbers<[1], [0], [0], [1], [0, 0, 1, 1], [], []>} : vector<288x128xf32>, vector<128x128xf32>, vector<288x128xf32> -> vector<288x128xf32>
    %54 = arith.addf %48, %53 : vector<288x128xf32>
    %c0_48 = arith.constant 0 : index
    %c0_49 = arith.constant 0 : index
    %55 = vector.load %arg3[%c0_48, %c0_49] : memref<1x128xf32, #tpu.memory_space<vmem>>, vector<1x128xf32>
    %56 = vector.broadcast %55 : vector<1x128xf32> to vector<288x128xf32>
    %57 = arith.addf %54, %56 : vector<288x128xf32>
    %cst_50 = arith.constant 0.000000e+00 : f32
    %58 = vector.broadcast %cst_50 : f32 to vector<288x128xf32>
    %59 = arith.cmpf oge, %57, %58 : vector<288x128xf32>
    %cst_51 = arith.constant 2.000000e-01 : f32
    %60 = vector.broadcast %cst_51 : f32 to vector<288x128xf32>
    %61 = arith.mulf %60, %57 : vector<288x128xf32>
    %62 = arith.select %59, %57, %61 : vector<288x128xi1>, vector<288x128xf32>
    %c0_52 = arith.constant 0 : index
    %c0_53 = arith.constant 0 : index
    %c0_54 = arith.constant 0 : index
    %63 = vector.load %arg4[%c0_52, %c0_53, %c0_54] : memref<1x288x128xf32, #tpu.memory_space<vmem>>, vector<1x288x128xf32>
    %64 = vector.shape_cast %63 : vector<1x288x128xf32> to vector<288x128xf32>
    %65 = vector.shape_cast %62 : vector<288x128xf32> to vector<1x288x128xf32>
    tpu.vector_store %arg4[%c0_52, %c0_53, %c0_54], %65 {strides = array<i32>} : memref<1x288x128xf32, #tpu.memory_space<vmem>>, vector<1x288x128xf32>,
    return
  }
  func.func @transform_0(%arg0: i32) -> (i32, i32, i32) {
    %c0_i32 = arith.constant 0 : i32
    %c0_i32_0 = arith.constant 0 : i32
    %c0_i32_1 = arith.constant 0 : i32
    return %arg0, %c0_i32, %c0_i32_0 : i32, i32, i32
  }
  func.func @transform_1(%arg0: i32) -> (i32, i32, i32) {
    %c0_i32 = arith.constant 0 : i32
    %c0_i32_0 = arith.constant 0 : i32
    %c0_i32_1 = arith.constant 0 : i32
    %c0_i32_2 = arith.constant 0 : i32
    return %c0_i32, %c0_i32_0, %c0_i32_1 : i32, i32, i32
  }
  func.func @transform_2(%arg0: i32) -> (i32, i32) {
    %c0_i32 = arith.constant 0 : i32
    %c0_i32_0 = arith.constant 0 : i32
    %c0_i32_1 = arith.constant 0 : i32
    return %c0_i32, %c0_i32_0 : i32, i32
  }
  func.func @transform_3(%arg0: i32) -> (i32, i32, i32) {
    %c0_i32 = arith.constant 0 : i32
    %c0_i32_0 = arith.constant 0 : i32
    %c0_i32_1 = arith.constant 0 : i32
    return %arg0, %c0_i32, %c0_i32_0 : i32, i32, i32
  }
}

</mosaic_0001>

<bundles_post_ra>
// kernel: tpu_custom_call.1
= control target key start
LH: loop header
LB: loop body
LE: loop exit
PB: predicated region body
PF: predicated region fallthrough
CT: control target
= control target key end

     0   :  { %8 = vsyncpa [#allocation3], 0  ;;  %s3680_s0 = inlined_call_operand.vmem [shape: f32[2,326,128], index: 0, kind: input, shape index: {}]   ;;  %s3681_s1 = inlined_call_operand.vmem [shape: f32[9,128,128], index: 1, kind: input, shape index: {}]   ;;  %s3682_s2 = inlined_call_operand.vmem [shape: f32[1,128], index: 2, kind: input, shape index: {}]   ;;  %s3683_s3 = inlined_call_operand.hbm [shape: f32[2,288,128], index: 3, kind: output, shape index: {}]  }
   0x1   :  { %10 = vsyncpa [#allocation3 + $0x1], 0  ;;  %s2600_s12 = smov 0   ;;  %s2602_s13 = smov 0  }
   0x2   :  { %s2604_s14 = smov 0   ;;  %s2606_s15 = smov 0  }
   0x3 LB: > { %s2621_s16 = sadd.s32 4294967295, %s2576_s15   ;;  %s2284_s17 = sadd.s32 4294967294, %s2576_s15   ;;  %s2576_s15 = sphi %s2606_s15, %s3689_s15   ;;  %s2572_s14 = sphi %s2604_s14, %s3688_s14   ;;  %s2568_s13 = sphi %s2602_s13, %s3687_s13   ;;  %s2564_s12 = sphi %s2600_s12, %s3686_s12  }
   0x4   : > { %s2625_s18 = sadd.s32 1, %s2576_s15   ;;  %s91_s19 = sadd.s32 1, %s2572_s14 }
   0x5   : > { %s88_s20 = ssub.s32 %s2576_s15, %s2625_s18  ;;  %p101_p0 = scmp.ne.s32.totalorder %s2572_s14, %s2568_s13 }
   0x6   : > { %p89_p1 = scmp.eq.s32.totalorder %s88_s20, 0  ;;  %p102_p2 = scmp.eq.s32.totalorder %s2621_s16, 1 }
   0x7   : > { %p107_p3 = scmp.ne.s32.totalorder %s2568_s13, %s2564_s12  ;;  %p108_p4 = scmp.eq.s32.totalorder %s2284_s17, 1 }
   0x8   : > { %s2636_s21 = scalar_select %p89_p1, %s2572_s14, %s91_s19  }
   0x9   : > { %p2638_p5 = por %p102_p2, %p101_p0  ;;  %p2642_p6 = por %p108_p4, %p107_p3 }
   0xa   : > { %p2287_p7 = scmp.ge.s32.totalorder %s2576_s15, 1  ;;  %p140_p8 = scmp.lt.s32.totalorder %s2576_s15, 3 }
   0xc   : > { %p141_p9 = pnand %p2287_p7, %p140_p8 }
   0xd   : > { %p164_p10 = scmp.lt.s32.totalorder (!%p141_p9), %s2621_s16, 1  ;;  %s161_s26 = sand.u32 (!%p141_p9), 1, %s2568_s13  }
   0xe   : > { %144 = sbr.rel (%p141_p9) target bundleno = 838 (0x346), region = 32  ;;  %s2534_s25 = scalar_lea.hbm (!%p141_p9), %s3683_s3, 576 }
   0xf   : > { %s2468_s29 = smul.u32 (!%p141_p9), 288, %s161_s26 }
  0x10   : > { %s2470_s5 = smul.u32 (!%p141_p9), 288, %s2621_s16 }
  0x11   : > { %s3481_s30 = scalar_lea.vmem (!%p141_p9), [#allocation2], %s2468_s29 }
  0x12   : > { %s2218_s8 = scalar_lea.hbm (!%p141_p9), %s3683_s3, %s2470_s5  ;;  %s2219_s9 = sshll.u32 (!%p141_p9), %s3481_s30, 4  ;;  %s2220_s9 = int_to_ptr.vmem [resolvable:$true] %s2219_s9 }
  0x13   : > { %v2304_v0 = vld [vmem:[%s3681_s1 + $0xf8] sm:$0xff]  ;;  %v2303_v1 = vld [vmem:[%s3681_s1 + $0xf0] sm:$0xff]  ;;  %v2302_v2 = vld [vmem:[%s3681_s1 + $0xe8] sm:$0xff]  ;;  %s165_s28 = scalar_select %p164_p10, %s2621_s16, 1 }
  0x14   : > { %2420 = vmatpush.msra.mxu1 %v2304_v0  ;;  %2421 = vmatpush.msra.mxu2 %v2304_v0  ;;  %v2301_v3 = vld [vmem:[%s3681_s1 + $0xe0] sm:$0xff]  ;;  %v2300_v4 = vld [vmem:[%s3681_s1 + $0xd8] sm:$0xff]  ;;  %v2299_v5 = vld [vmem:[%s3681_s1 + $0xd0] sm:$0xff]  ;;  %s2221_s10 = sshll.u32 %s2218_s8, 4  ;;  %s2207_s16 = scalar_lea.sflag [#allocation3], %s161_s26  ;;  %s2222_s10 = int_to_ptr.hbm [resolvable:$true] %s2221_s10 }
  0x15   : > { %2422 = vmatpush.msra.mxu3 %v2304_v0  ;;  %274 = vmatpush.msra.mxu0 %v2304_v0  ;;  %v2298_v6 = vld [vmem:[%s3681_s1 + $0xc8] sm:$0xff]  ;;  %v2297_v7 = vld [vmem:[%s3681_s1 + $0xc0] sm:$0xff]  ;;  %v2296_v8 = vld [vmem:[%s3681_s1 + $0xb8] sm:$0xff]  ;;  %s2469_s6 = smul.u32 328, %s165_s28  ;;  %s2528_s11 = sshra.s32 %s2222_s10, 4  ;;  %s2529_s11 = int_to_ptr.hbm [resolvable:$true] %s2528_s11 }
  0x16   : > { %2423 = vmatpush.msra.mxu1 %v2303_v1  ;;  %2424 = vmatpush.msra.mxu2 %v2303_v1  ;;  %v2295_v9 = vld [vmem:[%s3681_s1 + $0xb0] sm:$0xff]  ;;  %v2294_v10 = vld [vmem:[%s3681_s1 + $0xa8] sm:$0xff]  ;;  %v2293_v11 = vld [vmem:[%s3681_s1 + $0xa0] sm:$0xff]  ;;  %s2530_s17 = scalar_lea.hbm %s2529_s11, 288  ;;  %p2535_p0 = scmp.lt.s32.totalorder %s2529_s11, %s3683_s3 }
  0x17   : > { %2425 = vmatpush.msra.mxu3 %v2303_v1  ;;  %275 = vmatpush.msra.mxu0 %v2303_v1  ;;  %v2292_v12 = vld [vmem:[%s3681_s1 + $0x98] sm:$0xff]  ;;  %v2291_v13 = vld [vmem:[%s3681_s1 + $0x90] sm:$0xff]  ;;  %v2290_v14 = vld [vmem:[%s3681_s1 + $0x88] sm:$0xff]  ;;  %s2698_s19 = scalar_lea.vmem %s3680_s0, %s2469_s6  ;;  %p2531_p11 = scmp.ne.s32.totalorder %s2529_s11, %s2530_s17 }
  0x18   : > { %2426 = vmatpush.msra.mxu1 %v2302_v2  ;;  %2427 = vmatpush.msra.mxu2 %v2302_v2  ;;  %v2289_v15 = vld [vmem:[%s3681_s1 + $0x80] sm:$0xff]  ;;  %v230_v16 = vld [vmem:[%s2698_s19 + $0x49] sm:$0xff]  ;;  %v239_v17 = vld [vmem:[%s2698_s19 + $0x91] sm:$0xff]  ;;  %p2536_p1 = scmp.lt.s32.totalorder %s2534_s25, %s2530_s17 }
  0x19   : > { %2428 = vmatpush.msra.mxu3 %v2302_v2  ;;  %276 = vmatpush.msra.mxu0 %v2302_v2  ;;  %v2320_v18 = vld [vmem:[%s3681_s1 + $0x178] sm:$0xff]  ;;  %v2319_v22 = vld [vmem:[%s3681_s1 + $0x170] sm:$0xff]  ;;  %v2318_v25 = vld [vmem:[%s3681_s1 + $0x168] sm:$0xff]  ;;  %p2532_p12 = pnand %p2531_p11, %p2638_p5 }
  0x1a   : > { %2429 = vmatpush.msra.mxu1 %v2301_v3  ;;  %2430 = vmatpush.msra.mxu2 %v2301_v3  ;;  %v248_v19 = vld [vmem:[%s2698_s19 + $0xd9] sm:$0xff]  ;;  %v219_v23 = vld [vmem:[%s3681_s1 + $0x70] sm:$0xff]  ;;  %v221_v26 = vld [vmem:[%s2698_s19 + $0x1] sm:$0xff]  ;;  %p2537_p2 = por %p2536_p1, %p2535_p0 }
  0x1b   : > { %2431 = vmatpush.msra.mxu3 %v2301_v3  ;;  %277 = vmatpush.msra.mxu0 %v2301_v3  ;;  %v220_v20 = vld [vmem:[%s3681_s1 + $0x78] sm:$0xff]  ;;  %v2335_v24 = vld [vmem:[%s3681_s1 + $0x1f0] sm:$0xff]  ;;  %v218_v27 = vld [vmem:[%s3681_s1 + $0x68] sm:$0xff]  ;;  %p2533_p13 = pneg %p2532_p12 }
  0x1c   : > { %2432 = vmatpush.msra.mxu1 %v2300_v4  ;;  %2433 = vmatpush.msra.mxu2 %v2300_v4  ;;  %v2336_v21 = vld [vmem:[%s3681_s1 + $0x1f8] sm:$0xff]  ;;  %v2334_v29 = vld [vmem:[%s3681_s1 + $0x1e8] sm:$0xff]  ;;  %v2317_v32 = vld [vmem:[%s3681_s1 + $0x160] sm:$0xff] }
  0x1d   : > { %2434 = vmatpush.msra.mxu3 %v2300_v4  ;;  %278 = vmatpush.msra.mxu0 %v2300_v4  ;;  %v2352_v28 = vld [vmem:[%s3681_s1 + $0x278] sm:$0xff]  ;;  %v2351_v33 = vld [vmem:[%s3681_s1 + $0x270] sm:$0xff]  ;;  %v249_v34 = vld [vmem:[%s2698_s19 + $0xe1] sm:$0xff]  ;;  %p2538_p3 = pnand %p2537_p2, %p2533_p13 }
  0x1e   : > { %2435 = vmatpush.msra.mxu1 %v2299_v5  ;;  %2436 = vmatpush.msra.mxu2 %v2299_v5  ;;  %v231_v30 = vld [vmem:[%s2698_s19 + $0x51] sm:$0xff]  ;;  %v240_v31 = vld [vmem:[%s2698_s19 + $0x99] sm:$0xff]  ;;  %v2350_v38 = vld [vmem:[%s3681_s1 + $0x268] sm:$0xff] }
  0x1f   : > { %2437 = vmatpush.msra.mxu3 %v2299_v5  ;;  %279 = vmatpush.msra.mxu0 %v2299_v5  ;;  %v217_v35 = vld [vmem:[%s3681_s1 + $0x60] sm:$0xff]  ;;  %v2316_v37 = vld [vmem:[%s3681_s1 + $0x158] sm:$0xff]  ;;  %v2315_v41 = vld [vmem:[%s3681_s1 + $0x150] sm:$0xff] }
  0x20   : > { %2438 = vmatpush.msra.mxu1 %v2298_v6  ;;  %2439 = vmatpush.msra.mxu2 %v2298_v6  ;;  %v2333_v36 = vld [vmem:[%s3681_s1 + $0x1e0] sm:$0xff]  ;;  %v216_v39 = vld [vmem:[%s3681_s1 + $0x58] sm:$0xff]  ;;  %v222_v42 = vld [vmem:[%s2698_s19 + $0x9] sm:$0xff] }
  0x21   : > { %2440 = vmatpush.msra.mxu3 %v2298_v6  ;;  %280 = vmatpush.msra.mxu0 %v2298_v6  ;;  %v2332_v40 = vld [vmem:[%s3681_s1 + $0x1d8] sm:$0xff]  ;;  %v215_v43 = vld [vmem:[%s3681_s1 + $0x50] sm:$0xff]  ;;  %v2349_v44 = vld [vmem:[%s3681_s1 + $0x260] sm:$0xff] }
  0x22   : > { %2441 = vmatpush.msra.mxu1 %v2297_v7  ;;  %2442 = vmatpush.msra.mxu2 %v2297_v7  ;;  %v2331_v45 = vld [vmem:[%s3681_s1 + $0x1d0] sm:$0xff]  ;;  %v232_v46 = vld [vmem:[%s2698_s19 + $0x59] sm:$0xff]  ;;  %v241_v47 = vld [vmem:[%s2698_s19 + $0xa1] sm:$0xff] }
  0x23   : > { %2443 = vmatpush.msra.mxu3 %v2297_v7  ;;  %281 = vmatpush.msra.mxu0 %v2297_v7  ;;  %v2314_v48 = vld [vmem:[%s3681_s1 + $0x148] sm:$0xff]  ;;  %v2348_v49 = vld [vmem:[%s3681_s1 + $0x258] sm:$0xff]  ;;  %v2313_v53 = vld [vmem:[%s3681_s1 + $0x140] sm:$0xff] }
  0x24   : > { %2444 = vmatpush.msra.mxu1 %v2296_v8  ;;  %2445 = vmatpush.msra.mxu2 %v2296_v8  ;;  %v250_v50 = vld [vmem:[%s2698_s19 + $0xe9] sm:$0xff]  ;;  %v213_v55 = vld [vmem:[%s3681_s1 + $0x40] sm:$0xff]  ;;  %v2312_v57 = vld [vmem:[%s3681_s1 + $0x138] sm:$0xff] }
  0x25   : > { %2446 = vmatpush.msra.mxu3 %v2296_v8  ;;  %282 = vmatpush.msra.mxu0 %v2296_v8  ;;  %v214_v51 = vld [vmem:[%s3681_s1 + $0x48] sm:$0xff]  ;;  %v2347_v54 = vld [vmem:[%s3681_s1 + $0x250] sm:$0xff]  ;;  %v2329_v56 = vld [vmem:[%s3681_s1 + $0x1c0] sm:$0xff] }
  0x26   : > { %2447 = vmatpush.msra.mxu1 %v2295_v9  ;;  %2448 = vmatpush.msra.mxu2 %v2295_v9  ;;  %v2330_v52 = vld [vmem:[%s3681_s1 + $0x1c8] sm:$0xff]  ;;  %v223_v58 = vld [vmem:[%s2698_s19 + $0x11] sm:$0xff]  ;;  %v2345_v1 = vld [vmem:[%s3681_s1 + $0x240] sm:$0xff] }
  0x27   : > { %2449 = vmatpush.msra.mxu3 %v2295_v9  ;;  %283 = vmatpush.msra.mxu0 %v2295_v9  ;;  %v212_v59 = vld [vmem:[%s3681_s1 + $0x38] sm:$0xff]  ;;  %v2346_v60 = vld [vmem:[%s3681_s1 + $0x248] sm:$0xff]  ;;  %v2311_v0 = vld [vmem:[%s3681_s1 + $0x130] sm:$0xff] }
  0x28   : > { %2450 = vmatpush.msra.mxu1 %v2294_v10  ;;  %2451 = vmatpush.msra.mxu2 %v2294_v10  ;;  %v2328_v61 = vld [vmem:[%s3681_s1 + $0x1b8] sm:$0xff]  ;;  %v233_v62 = vld [vmem:[%s2698_s19 + $0x61] sm:$0xff]  ;;  %v242_v63 = vld [vmem:[%s2698_s19 + $0xa9] sm:$0xff] }
  0x29   : > { %2452 = vmatpush.msra.mxu3 %v2294_v10  ;;  %284 = vmatpush.msra.mxu0 %v2294_v10  ;;  %v251_v2 = vld [vmem:[%s2698_s19 + $0xf1] sm:$0xff]  ;;  %v2310_v5 = vld [vmem:[%s3681_s1 + $0x128] sm:$0xff]  ;;  %v2309_v9 = vld [vmem:[%s3681_s1 + $0x120] sm:$0xff] }
  0x2a   : > { %2453 = vmatpush.msra.mxu1 %v2293_v11  ;;  %2454 = vmatpush.msra.mxu2 %v2293_v11  ;;  %v211_v3 = vld [vmem:[%s3681_s1 + $0x30] sm:$0xff]  ;;  %v2344_v6 = vld [vmem:[%s3681_s1 + $0x238] sm:$0xff]  ;;  %v210_v7 = vld [vmem:[%s3681_s1 + $0x28] sm:$0xff] }
  0x2b   : > { %2455 = vmatpush.msra.mxu3 %v2293_v11  ;;  %285 = vmatpush.msra.mxu0 %v2293_v11  ;;  %v2327_v4 = vld [vmem:[%s3681_s1 + $0x1b0] sm:$0xff]  ;;  %v2326_v8 = vld [vmem:[%s3681_s1 + $0x1a8] sm:$0xff]  ;;  %v224_v10 = vld [vmem:[%s2698_s19 + $0x19] sm:$0xff] }
  0x2c   : > { %2456 = vmatpush.msra.mxu1 %v2292_v12  ;;  %2457 = vmatpush.msra.mxu2 %v2292_v12  ;;  %v209_v11 = vld [vmem:[%s3681_s1 + $0x20] sm:$0xff] }
  0x2d   : > { %2458 = vmatpush.msra.mxu3 %v2292_v12  ;;  %286 = vmatpush.msra.mxu0 %v2292_v12  ;;  %v2343_v12 = vld [vmem:[%s3681_s1 + $0x230] sm:$0xff] }
  0x2e   : > { %2459 = vmatpush.msra.mxu1 %v2291_v13  ;;  %2460 = vmatpush.msra.mxu2 %v2291_v13 }
  0x2f   : > { %2461 = vmatpush.msra.mxu3 %v2291_v13  ;;  %287 = vmatpush.msra.mxu0 %v2291_v13  ;;  %v2325_v13 = vld [vmem:[%s3681_s1 + $0x1a0] sm:$0xff] }
  0x30   : > { %2462 = vmatpush.msra.mxu1 %v2290_v14  ;;  %2463 = vmatpush.msra.mxu2 %v2290_v14 }
  0x31   : > { %2464 = vmatpush.msra.mxu3 %v2290_v14  ;;  %288 = vmatpush.msra.mxu0 %v2290_v14  ;;  %v234_v14 = vld [vmem:[%s2698_s19 + $0x69] sm:$0xff] }
  0x32   : > { %2465 = vmatpush.msra.mxu1 %v2289_v15  ;;  %2466 = vmatpush.msra.mxu2 %v2289_v15 }
  0x33   : > { %317 = vmatmul.f32.vlgmr.msra.gmra.mxu1 %v230_v16  ;;  %344 = vmatmul.f32.vlgmr.msra.gmra.mxu2 %v239_v17  ;;  %v2308_v16 = vld [vmem:[%s3681_s1 + $0x118] sm:$0xff]  ;;  %v2342_v17 = vld [vmem:[%s3681_s1 + $0x228] sm:$0xff] }
  0x34   : > { %577 = vmatpush.msrb.mxu2 %v2320_v18  ;;  %2467 = vmatpush.msra.mxu3 %v2289_v15  ;;  %v252_v18 = vld [vmem:[%s2698_s19 + $0xf9] sm:$0xff] }
  0x35   : > { %371 = vmatmul.f32.vlgmr.msra.gmra.mxu3 %v248_v19  ;;  %399 = vmatpush.msrb.mxu1 %v220_v20  ;;  %v208_v19 = vld [vmem:[%s3681_s1 + $0x18] sm:$0xff] }
  0x36   : > { %791 = vmatpush.msrb.mxu3 %v2336_v21  ;;  %578 = vmatpush.msrb.mxu2 %v2319_v22  ;;  %v2324_v20 = vld [vmem:[%s3681_s1 + $0x198] sm:$0xff]  ;;  %v2307_v21 = vld [vmem:[%s3681_s1 + $0x110] sm:$0xff]  ;;  %v2341_v22 = vld [vmem:[%s3681_s1 + $0x220] sm:$0xff] }
  0x37   : > { %289 = vmatpush.msra.mxu0 %v2289_v15  ;;  %400 = vmatpush.msrb.mxu1 %v219_v23  ;;  %v243_v15 = vld [vmem:[%s2698_s19 + $0xb1] sm:$0xff] }
  0x38   : > { %792 = vmatpush.msrb.mxu3 %v2335_v24  ;;  %579 = vmatpush.msrb.mxu2 %v2318_v25  ;;  %v207_v23 = vld [vmem:[%s3681_s1 + $0x10] sm:$0xff]  ;;  %v2306_v25 = vld [vmem:[%s3681_s1 + $0x108] sm:$0xff] }
  0x39   : > { %290 = vmatmul.f32.vlgmr.msra.gmra.mxu0 %v221_v26  ;;  %401 = vmatpush.msrb.mxu1 %v218_v27  ;;  %v2323_v24 = vld [vmem:[%s3681_s1 + $0x190] sm:$0xff]  ;;  %v225_v26 = vld [vmem:[%s2698_s19 + $0x21] sm:$0xff] }
  0x3a   : > { %1005 = vmatpush.msrb.mxu0 %v2352_v28  ;;  %793 = vmatpush.msrb.mxu3 %v2334_v29  ;;  %v206_v27 = vld [vmem:[%s3681_s1 + $0x8] sm:$0xff]  ;;  %v2340_v28 = vld [vmem:[%s3681_s1 + $0x218] sm:$0xff] }
  0x3b   : > { %320 = vmatmul.f32.gmra.mxu1 %v231_v30  ;;  %347 = vmatmul.f32.gmra.mxu2 %v240_v31  ;;  %v2322_v29 = vld [vmem:[%s3681_s1 + $0x188] sm:$0xff]  ;;  %v235_v30 = vld [vmem:[%s2698_s19 + $0x71] sm:$0xff]  ;;  %v244_v31 = vld [vmem:[%s2698_s19 + $0xb9] sm:$0xff] }
  0x3c   : > { %580 = vmatpush.msrb.mxu2 %v2317_v32  ;;  %1006 = vmatpush.msrb.mxu0 %v2351_v33  ;;  %v2305_v32 = vld [vmem:[%s3681_s1 + $0x100] sm:$0xff]  ;;  %v2339_v33 = vld [vmem:[%s3681_s1 + $0x210] sm:$0xff] }
  0x3d   : > { %374 = vmatmul.f32.gmra.mxu3 %v249_v34  ;;  %402 = vmatpush.msrb.mxu1 %v217_v35  ;;  %v253_v34 = vld [vmem:[%s2698_s19 + $0x101] sm:$0xff] }
  0x3e   : > { %794 = vmatpush.msrb.mxu3 %v2333_v36  ;;  %581 = vmatpush.msrb.mxu2 %v2316_v37  ;;  %v205_v35 = vld [vmem:[%s3681_s1] sm:$0xff]  ;;  %v2384_v37 = vld [vmem:[%s3681_s1 + $0x378] sm:$0xff] }
  0x3f   : > { %1007 = vmatpush.msrb.mxu0 %v2350_v38  ;;  %403 = vmatpush.msrb.mxu1 %v216_v39  ;;  %v2321_v36 = vld [vmem:[%s3681_s1 + $0x180] sm:$0xff]  ;;  %v2338_v38 = vld [vmem:[%s3681_s1 + $0x208] sm:$0xff]  ;;  %v2400_v39 = vld [vmem:[%s3681_s1 + $0x3f8] sm:$0xff] }
  0x40   : > { %795 = vmatpush.msrb.mxu3 %v2332_v40  ;;  %582 = vmatpush.msrb.mxu2 %v2315_v41  ;;  %v2368_v40 = vld [vmem:[%s3681_s1 + $0x2f8] sm:$0xff]  ;;  %v226_v41 = vld [vmem:[%s2698_s19 + $0x29] sm:$0xff] }
  0x41   : > { %293 = vmatmul.f32.gmra.mxu0 %v222_v42  ;;  %404 = vmatpush.msrb.mxu1 %v215_v43  ;;  %v2337_v42 = vld [vmem:[%s3681_s1 + $0x200] sm:$0xff] }
  0x42   : > { %1008 = vmatpush.msrb.mxu0 %v2349_v44  ;;  %796 = vmatpush.msrb.mxu3 %v2331_v45  ;;  %v236_v43 = vld [vmem:[%s2698_s19 + $0x79] sm:$0xff]  ;;  %v245_v44 = vld [vmem:[%s2698_s19 + $0xc1] sm:$0xff]  ;;  %v254_v45 = vld [vmem:[%s2698_s19 + $0x109] sm:$0xff] }
  0x43   : > { %323 = vmatmul.f32.gmra.mxu1 %v232_v46  ;;  %350 = vmatmul.f32.gmra.mxu2 %v241_v47  ;;  %v2416_v46 = vld [vmem:[%s3681_s1 + $0x478] sm:$0xff] }
  0x44   : > { %583 = vmatpush.msrb.mxu2 %v2314_v48  ;;  %1009 = vmatpush.msrb.mxu0 %v2348_v49  ;;  %v227_v47 = vld [vmem:[%s2698_s19 + $0x31] sm:$0xff]  ;;  %v237_v48 = vld [vmem:[%s2698_s19 + $0x81] sm:$0xff]  ;;  %v246_v49 = vld [vmem:[%s2698_s19 + $0xc9] sm:$0xff] }
  0x45   : > { %377 = vmatmul.f32.gmra.mxu3 %v250_v50  ;;  %405 = vmatpush.msrb.mxu1 %v214_v51  ;;  %v255_v50 = vld [vmem:[%s2698_s19 + $0x111] sm:$0xff] }
  0x46   : > { %797 = vmatpush.msrb.mxu3 %v2330_v52  ;;  %584 = vmatpush.msrb.mxu2 %v2313_v53  ;;  %v2383_v51 = vld [vmem:[%s3681_s1 + $0x370] sm:$0xff] }
  0x47   : > { %1010 = vmatpush.msrb.mxu0 %v2347_v54  ;;  %406 = vmatpush.msrb.mxu1 %v213_v55  ;;  %v2399_v52 = vld [vmem:[%s3681_s1 + $0x3f0] sm:$0xff]  ;;  %v228_v54 = vld [vmem:[%s2698_s19 + $0x39] sm:$0xff] }
  0x48   : > { %798 = vmatpush.msrb.mxu3 %v2329_v56  ;;  %585 = vmatpush.msrb.mxu2 %v2312_v57  ;;  %v2367_v53 = vld [vmem:[%s3681_s1 + $0x2f0] sm:$0xff]  ;;  %v256_v57 = vld [vmem:[%s2698_s19 + $0x119] sm:$0xff] }
  0x49   : > { %296 = vmatmul.f32.gmra.mxu0 %v223_v58  ;;  %407 = vmatpush.msrb.mxu1 %v212_v59  ;;  %v238_v55 = vld [vmem:[%s2698_s19 + $0x89] sm:$0xff]  ;;  %v247_v56 = vld [vmem:[%s2698_s19 + $0xd1] sm:$0xff]  ;;  %v229_v59 = vld [vmem:[%s2698_s19 + $0x41] sm:$0xff] }
  0x4a   : > { %1011 = vmatpush.msrb.mxu0 %v2346_v60  ;;  %799 = vmatpush.msrb.mxu3 %v2328_v61  ;;  %v2415_v58 = vld [vmem:[%s3681_s1 + $0x470] sm:$0xff]  ;;  %v169_v60 = vld [vmem:[%s2698_s19] sm:$0xff] }
  0x4b   : > { %326 = vmatmul.f32.gmra.mxu1 %v233_v62  ;;  %353 = vmatmul.f32.gmra.mxu2 %v242_v63  ;;  %v524_v61 = vld [vmem:[%s2698_s19 + $0x2] sm:$0xff]  ;;  %v738_v62 = vld [vmem:[%s2698_s19 + $0x12] sm:$0xff] }
  0x4c   : > { %586 = vmatpush.msrb.mxu2 %v2311_v0  ;;  %1012 = vmatpush.msrb.mxu0 %v2345_v1  ;;  %v2382_v63 = vld [vmem:[%s3681_s1 + $0x368] sm:$0xff]  ;;  %v952_v1 = vld [vmem:[%s2698_s19 + $0x13] sm:$0xff] }
  0x4d   : > { %380 = vmatmul.f32.gmra.mxu3 %v251_v2  ;;  %408 = vmatpush.msrb.mxu1 %v211_v3  ;;  %v2398_v0 = vld [vmem:[%s3681_s1 + $0x3e8] sm:$0xff] }
  0x4e   : > { %800 = vmatpush.msrb.mxu3 %v2327_v4  ;;  %587 = vmatpush.msrb.mxu2 %v2310_v5  ;;  %v170_v2 = vld [vmem:[%s2698_s19 + $0x8] sm:$0xff]  ;;  %v739_v4 = vld [vmem:[%s2698_s19 + $0x1a] sm:$0xff] }
  0x4f   : > { %1013 = vmatpush.msrb.mxu0 %v2344_v6  ;;  %409 = vmatpush.msrb.mxu1 %v210_v7  ;;  %v525_v3 = vld [vmem:[%s2698_s19 + $0xa] sm:$0xff]  ;;  %v953_v7 = vld [vmem:[%s2698_s19 + $0x1b] sm:$0xff] }
  0x50   : > { %801 = vmatpush.msrb.mxu3 %v2326_v8  ;;  %588 = vmatpush.msrb.mxu2 %v2309_v9  ;;  %v2366_v5 = vld [vmem:[%s3681_s1 + $0x2e8] sm:$0xff]  ;;  %v171_v8 = vld [vmem:[%s2698_s19 + $0x10] sm:$0xff] }
  0x51   : > { %299 = vmatmul.f32.gmra.mxu0 %v224_v10  ;;  %410 = vmatpush.msrb.mxu1 %v209_v11  ;;  %v2414_v6 = vld [vmem:[%s3681_s1 + $0x468] sm:$0xff]  ;;  %v172_v11 = vld [vmem:[%s2698_s19 + $0x18] sm:$0xff] }
  0x52   : > { %1014 = vmatpush.msrb.mxu0 %v2343_v12  ;;  %802 = vmatpush.msrb.mxu3 %v2325_v13  ;;  %v740_v9 = vld [vmem:[%s2698_s19 + $0x22] sm:$0xff]  ;;  %v741_v13 = vld [vmem:[%s2698_s19 + $0x2a] sm:$0xff] }
  0x53   : > { %329 = vmatmul.f32.gmra.mxu1 %v234_v14  ;;  %356 = vmatmul.f32.gmra.mxu2 %v243_v15  ;;  %v954_v10 = vld [vmem:[%s2698_s19 + $0x23] sm:$0xff] }
  0x54   : > { %589 = vmatpush.msrb.mxu2 %v2308_v16  ;;  %1015 = vmatpush.msrb.mxu0 %v2342_v17  ;;  %v2381_v12 = vld [vmem:[%s3681_s1 + $0x360] sm:$0xff]  ;;  %v955_v16 = vld [vmem:[%s2698_s19 + $0x2b] sm:$0xff] }
  0x55   : > { %383 = vmatmul.f32.gmra.mxu3 %v252_v18  ;;  %411 = vmatpush.msrb.mxu1 %v208_v19  ;;  %v2397_v14 = vld [vmem:[%s3681_s1 + $0x3e0] sm:$0xff]  ;;  %v742_v18 = vld [vmem:[%s2698_s19 + $0x32] sm:$0xff] }
  0x56   : > { %803 = vmatpush.msrb.mxu3 %v2324_v20  ;;  %590 = vmatpush.msrb.mxu2 %v2307_v21  ;;  %v2365_v15 = vld [vmem:[%s3681_s1 + $0x2e0] sm:$0xff]  ;;  %v956_v20 = vld [vmem:[%s2698_s19 + $0x33] sm:$0xff]  ;;  %v174_v21 = vld [vmem:[%s2698_s19 + $0x28] sm:$0xff] }
  0x57   : > { %1016 = vmatpush.msrb.mxu0 %v2341_v22  ;;  %412 = vmatpush.msrb.mxu1 %v207_v23  ;;  %v173_v17 = vld [vmem:[%s2698_s19 + $0x20] sm:$0xff]  ;;  %v2380_v23 = vld [vmem:[%s3681_s1 + $0x358] sm:$0xff] }
  0x58   : > { %804 = vmatpush.msrb.mxu3 %v2323_v24  ;;  %591 = vmatpush.msrb.mxu2 %v2306_v25  ;;  %v2413_v19 = vld [vmem:[%s3681_s1 + $0x460] sm:$0xff]  ;;  %v2396_v24 = vld [vmem:[%s3681_s1 + $0x3d8] sm:$0xff] }
  0x59   : > { %302 = vmatmul.f32.gmra.mxu0 %v225_v26  ;;  %413 = vmatpush.msrb.mxu1 %v206_v27  ;;  %v743_v22 = vld [vmem:[%s2698_s19 + $0x3a] sm:$0xff]  ;;  %v175_v27 = vld [vmem:[%s2698_s19 + $0x30] sm:$0xff] }
  0x5a   : > { %1017 = vmatpush.msrb.mxu0 %v2340_v28  ;;  %805 = vmatpush.msrb.mxu3 %v2322_v29  ;;  %v957_v25 = vld [vmem:[%s2698_s19 + $0x3b] sm:$0xff] }
  0x5b   : > { %332 = vmatmul.f32.gmra.mxu1 %v235_v30  ;;  %359 = vmatmul.f32.gmra.mxu2 %v244_v31  ;;  %v2364_v26 = vld [vmem:[%s3681_s1 + $0x2d8] sm:$0xff]  ;;  %v744_v28 = vld [vmem:[%s2698_s19 + $0x42] sm:$0xff] }
  0x5c   : > { %592 = vmatpush.msrb.mxu2 %v2305_v32  ;;  %1018 = vmatpush.msrb.mxu0 %v2339_v33  ;;  %v2412_v29 = vld [vmem:[%s3681_s1 + $0x458] sm:$0xff]  ;;  %v958_v30 = vld [vmem:[%s2698_s19 + $0x43] sm:$0xff] }
  0x5d   : > { %386 = vmatmul.f32.gmra.mxu3 %v253_v34  ;;  %414 = vmatpush.msrb.mxu1 %v205_v35  ;;  %v176_v32 = vld [vmem:[%s2698_s19 + $0x38] sm:$0xff]  ;;  %v745_v33 = vld [vmem:[%s2698_s19 + $0x4a] sm:$0xff] }
  0x5e   : > { %806 = vmatpush.msrb.mxu3 %v2321_v36  ;;  %1433 = vmatpush.msra.mxu2 %v2384_v37  ;;  %v2379_v34 = vld [vmem:[%s3681_s1 + $0x350] sm:$0xff] }
  0x5f   : > { %1019 = vmatpush.msrb.mxu0 %v2338_v38  ;;  %1219 = vmatpush.msra.mxu1 %v2368_v40  ;;  %v959_v37 = vld [vmem:[%s2698_s19 + $0x4b] sm:$0xff] }
  0x60   : > { %1647 = vmatpush.msra.mxu3 %v2400_v39  ;;  %1434 = vmatpush.msra.mxu2 %v2383_v51  ;;  %v2395_v38 = vld [vmem:[%s3681_s1 + $0x3d0] sm:$0xff]  ;;  %v747_v51 = vld [vmem:[%s2698_s19 + $0x5a] sm:$0xff] }
  0x61   : > { %305 = vmatmul.f32.gmra.mxu0 %v226_v41  ;;  %1220 = vmatpush.msra.mxu1 %v2367_v53  ;;  %v177_v41 = vld [vmem:[%s2698_s19 + $0x40] sm:$0xff] }
  0x62   : > { %1020 = vmatpush.msrb.mxu0 %v2337_v42  ;;  %1648 = vmatpush.msra.mxu3 %v2399_v52  ;;  %v2363_v42 = vld [vmem:[%s3681_s1 + $0x2d0] sm:$0xff] }
  0x63   : > { %335 = vmatmul.f32.gmra.mxu1 %v236_v43  ;;  %362 = vmatmul.f32.gmra.mxu2 %v245_v44  ;;  %v746_v43 = vld [vmem:[%s2698_s19 + $0x52] sm:$0xff] }
  0x64   : > { %1861 = vmatpush.msra.mxu0 %v2416_v46  ;;  %1435 = vmatpush.msra.mxu2 %v2382_v63  ;;  %v960_v46 = vld [vmem:[%s2698_s19 + $0x53] sm:$0xff] }
  0x65   : > { %389 = vmatmul.f32.gmra.mxu3 %v254_v45  ;;  %1221 = vmatpush.msra.mxu1 %v2366_v5  ;;  %v749_v5 = vld [vmem:[%s2698_s19 + $0x6a] sm:$0xff] }
  0x66   : > { %1862 = vmatpush.msra.mxu0 %v2415_v58  ;;  %1649 = vmatpush.msra.mxu3 %v2398_v0  ;;  %v179_v58 = vld [vmem:[%s2698_s19 + $0x50] sm:$0xff]  ;;  %v962_v0 = vld [vmem:[%s2698_s19 + $0x63] sm:$0xff] }
  0x67   : > { %1436 = vmatpush.msra.mxu2 %v2381_v12  ;;  %1222 = vmatpush.msra.mxu1 %v2365_v15  ;;  %v2377_v12 = vld [vmem:[%s3681_s1 + $0x340] sm:$0xff] }
  0x68   : > { %1863 = vmatpush.msra.mxu0 %v2414_v6  ;;  %1650 = vmatpush.msra.mxu3 %v2397_v14  ;;  %v2393_v14 = vld [vmem:[%s3681_s1 + $0x3c0] sm:$0xff] }
  0x69   : > { %308 = vmatmul.f32.gmra.mxu0 %v227_v47  ;;  %1437 = vmatpush.msra.mxu2 %v2380_v23  ;;  %v2411_v47 = vld [vmem:[%s3681_s1 + $0x450] sm:$0xff]  ;;  %v2361_v15 = vld [vmem:[%s3681_s1 + $0x2c0] sm:$0xff] }
  0x6a   : > { %1864 = vmatpush.msra.mxu0 %v2413_v19  ;;  %1651 = vmatpush.msra.mxu3 %v2396_v24  ;;  %v2409_v23 = vld [vmem:[%s3681_s1 + $0x440] sm:$0xff] }
  0x6b   : > { %338 = vmatmul.f32.gmra.mxu1 %v237_v48  ;;  %365 = vmatmul.f32.gmra.mxu2 %v246_v49 }
  0x6c   : > { %1223 = vmatpush.msra.mxu1 %v2364_v26  ;;  %1865 = vmatpush.msra.mxu0 %v2412_v29  ;;  %v965_v26 = vld [vmem:[%s2698_s19 + $0x7b] sm:$0xff]  ;;  %v183_v29 = vld [vmem:[%s2698_s19 + $0x70] sm:$0xff] }
  0x6d   : > { %392 = vmatmul.f32.gmra.mxu3 %v255_v50  ;;  %1438 = vmatpush.msra.mxu2 %v2379_v34  ;;  %v178_v50 = vld [vmem:[%s2698_s19 + $0x48] sm:$0xff] }
  0x6e   : > { %1652 = vmatpush.msra.mxu3 %v2395_v38  ;;  %1224 = vmatpush.msra.mxu1 %v2363_v42  ;;  %v966_v38 = vld [vmem:[%s2698_s19 + $0x83] sm:$0xff] }
  0x6f   : > { %1866 = vmatpush.msra.mxu0 %v2411_v47  ;;  %v753_v47 = vld [vmem:[%s2698_s19 + $0x8a] sm:$0xff] }
  0x71   : > { %311 = vmatmul.f32.gmra.mxu0 %v228_v54  ;;  %v961_v54 = vld [vmem:[%s2698_s19 + $0x5b] sm:$0xff] }
  0x73   : > { %341 = vmatmul.f32.gmra.mxu1 %v238_v55  ;;  %368 = vmatmul.f32.gmra.mxu2 %v247_v56  ;;  %v2378_v55 = vld [vmem:[%s3681_s1 + $0x348] sm:$0xff] }
  0x74   : > { %1439 = vmatpush.msra.mxu2 %v2378_v55  ;;  %v967_v55 = vld [vmem:[%s2698_s19 + $0x8b] sm:$0xff] }
  0x75   : > { %395 = vmatmul.f32.gmra.mxu3 %v256_v57 }
  0x76   : > { %1440 = vmatpush.msra.mxu2 %v2377_v12  ;;  %v2391_v12 = vld [vmem:[%s3681_s1 + $0x3b0] sm:$0xff] }
  0x79   : > { %314 = vmatmul.f32.gmra.mxu0 %v229_v59  ;;  %v2394_v59 = vld [vmem:[%s3681_s1 + $0x3c8] sm:$0xff] }
  0x7a   : > { %1653 = vmatpush.msra.mxu3 %v2394_v59 }
  0x7b   : > { %415 = vmatmul.f32.vlgmr.msrb.gmra.mxu1 %v169_v60  ;;  %593 = vmatmul.f32.vlgmr.msrb.gmra.mxu2 %v524_v61  ;;  %v748_v60 = vld [vmem:[%s2698_s19 + $0x62] sm:$0xff] }
  0x7c   : > { %v2362_v61 = vld [vmem:[%s3681_s1 + $0x2c8] sm:$0xff]  ;;  %1654 = vmatpush.msra.mxu3 %v2393_v14 }
  0x7d   : > { %807 = vmatmul.f32.vlgmr.msrb.gmra.mxu3 %v738_v62  ;;  %1225 = vmatpush.msra.mxu1 %v2362_v61  ;;  %v754_v61 = vld [vmem:[%s2698_s19 + $0x92] sm:$0xff] }
  0x7f   : > { %1226 = vmatpush.msra.mxu1 %v2361_v15  ;;  %v186_v15 = vld [vmem:[%s2698_s19 + $0x88] sm:$0xff] }
  0x81   : > { %1021 = vmatmul.f32.vlgmr.msrb.gmra.mxu0 %v952_v1 }
  0x83   : > { %418 = vmatmul.f32.gmra.mxu1 %v170_v2  ;;  %596 = vmatmul.f32.gmra.mxu2 %v525_v3  ;;  %v180_v3 = vld [vmem:[%s2698_s19 + $0x58] sm:$0xff] }
  0x85   : > { %810 = vmatmul.f32.gmra.mxu3 %v739_v4 }
  0x89   : > { %1024 = vmatmul.f32.gmra.mxu0 %v953_v7 }
  0x8b   : > { %421 = vmatmul.f32.gmra.mxu1 %v171_v8  ;;  %599 = vmatmul.f32.gmra.mxu2 %v738_v62  ;;  %v963_v8 = vld [vmem:[%s2698_s19 + $0x6b] sm:$0xff] }
  0x8d   : > { %813 = vmatmul.f32.gmra.mxu3 %v740_v9 }
  0x91   : > { %1027 = vmatmul.f32.gmra.mxu0 %v954_v10 }
  0x93   : > { %424 = vmatmul.f32.gmra.mxu1 %v172_v11  ;;  %602 = vmatmul.f32.gmra.mxu2 %v739_v4  ;;  %v2410_v4 = vld [vmem:[%s3681_s1 + $0x448] sm:$0xff]  ;;  %v181_v11 = vld [vmem:[%s2698_s19 + $0x60] sm:$0xff] }
  0x94   : > { %1867 = vmatpush.msra.mxu0 %v2410_v4 }
  0x95   : > { %816 = vmatmul.f32.gmra.mxu3 %v741_v13 }
  0x96   : > { %1868 = vmatpush.msra.mxu0 %v2409_v23 }
  0x99   : > { %1030 = vmatmul.f32.gmra.mxu0 %v955_v16 }
  0x9b   : > { %427 = vmatmul.f32.gmra.mxu1 %v173_v17  ;;  %605 = vmatmul.f32.gmra.mxu2 %v740_v9 }
  0x9d   : > { %819 = vmatmul.f32.gmra.mxu3 %v742_v18 }
  0xa1   : > { %1033 = vmatmul.f32.gmra.mxu0 %v956_v20 }
  0xa3   : > { %430 = vmatmul.f32.gmra.mxu1 %v174_v21  ;;  %608 = vmatmul.f32.gmra.mxu2 %v741_v13  ;;  %v750_v13 = vld [vmem:[%s2698_s19 + $0x72] sm:$0xff]  ;;  %v182_v21 = vld [vmem:[%s2698_s19 + $0x68] sm:$0xff] }
  0xa5   : > { %822 = vmatmul.f32.gmra.mxu3 %v743_v22 }
  0xa9   : > { %1036 = vmatmul.f32.gmra.mxu0 %v957_v25 }
  0xab   : > { %433 = vmatmul.f32.gmra.mxu1 %v175_v27  ;;  %611 = vmatmul.f32.gmra.mxu2 %v742_v18  ;;  %v964_v18 = vld [vmem:[%s2698_s19 + $0x73] sm:$0xff] }
  0xad   : > { %825 = vmatmul.f32.gmra.mxu3 %v744_v28 }
  0xb0   : > { %v3014_v31 = vpop.f32.mrf.mxu1 }
  0xb1   : > { %1039 = vmatmul.f32.gmra.mxu0 %v958_v30  ;;  %v752_v30 = vld [vmem:[%s2698_s19 + $0x82] sm:$0xff] }
  0xb3   : > { %436 = vmatmul.f32.gmra.mxu1 %v176_v32  ;;  %614 = vmatmul.f32.gmra.mxu2 %v743_v22  ;;  %v751_v22 = vld [vmem:[%s2698_s19 + $0x7a] sm:$0xff] }
  0xb4   : > { %v2376_v32 = vld [vmem:[%s3681_s1 + $0x338] sm:$0xff] }
  0xb5   : > { %828 = vmatmul.f32.gmra.mxu3 %v745_v33  ;;  %1441 = vmatpush.msra.mxu2 %v2376_v32 }
  0xb6   : > { %v3021_v35 = vpop.f32.mrf.mxu2  ;;  %v3023_v36 = vpop.f32.mrf.mxu0 }
  0xb8   : > { %v3029_v39 = vpop.f32.mrf.mxu1  ;;  %v3031_v40 = vpop.f32.mrf.mxu3 }
  0xb9   : > { %1042 = vmatmul.f32.gmra.mxu0 %v959_v37 }
  0xbb   : > { %439 = vmatmul.f32.gmra.mxu1 %v177_v41  ;;  %617 = vmatmul.f32.gmra.mxu2 %v744_v28  ;;  %v2360_v41 = vld [vmem:[%s3681_s1 + $0x2b8] sm:$0xff] }
  0xbc   : > { %1227 = vmatpush.msra.mxu1 %v2360_v41 }
  0xbd   : > { %831 = vmatmul.f32.gmra.mxu3 %v746_v43 }
  0xbe   : > { %v3038_v44 = vpop.f32.mrf.mxu2  ;;  %v3040_v45 = vpop.f32.mrf.mxu0 }
  0xc0   : > { %v3046_v48 = vpop.f32.mrf.mxu1  ;;  %v3048_v49 = vpop.f32.mrf.mxu3 }
  0xc1   : > { %1045 = vmatmul.f32.gmra.mxu0 %v960_v46  ;;  %v184_v46 = vld [vmem:[%s2698_s19 + $0x78] sm:$0xff] }
  0xc3   : > { %442 = vmatmul.f32.gmra.mxu1 %v178_v50  ;;  %620 = vmatmul.f32.gmra.mxu2 %v745_v33  ;;  %v2392_v33 = vld [vmem:[%s3681_s1 + $0x3b8] sm:$0xff] }
  0xc4   : > { %1655 = vmatpush.msra.mxu3 %v2392_v33  ;;  %v2408_v50 = vld [vmem:[%s3681_s1 + $0x438] sm:$0xff]  ;;  %v2407_v33 = vld [vmem:[%s3681_s1 + $0x430] sm:$0xff] }
  0xc5   : > { %834 = vmatmul.f32.gmra.mxu3 %v747_v51  ;;  %1869 = vmatpush.msra.mxu0 %v2408_v50 }
  0xc6   : > { %v3052_v52 = vpop.f32.mrf.mxu2  ;;  %v3054_v53 = vpop.f32.mrf.mxu0  ;;  %1656 = vmatpush.msra.mxu3 %v2391_v12 }
  0xc7   : > { %1870 = vmatpush.msra.mxu0 %v2407_v33 }
  0xc8   : > { %v3060_v56 = vpop.f32.mrf.mxu1  ;;  %v3062_v57 = vpop.f32.mrf.mxu3 }
  0xc9   : > { %1048 = vmatmul.f32.gmra.mxu0 %v961_v54 }
  0xcb   : > { %445 = vmatmul.f32.gmra.mxu1 %v179_v58  ;;  %623 = vmatmul.f32.gmra.mxu2 %v746_v43 }
  0xcd   : > { %837 = vmatmul.f32.gmra.mxu3 %v748_v60 }
  0xce   : > { %v3072_v62 = vpop.f32.mrf.mxu2  ;;  %v3074_v63 = vpop.f32.mrf.mxu0 }
  0xd0   : > { %v3077_v1 = vpop.f32.mrf.mxu1  ;;  %v3079_v2 = vpop.f32.mrf.mxu3 }
  0xd1   : > { %1051 = vmatmul.f32.gmra.mxu0 %v962_v0 }
  0xd3   : > { %448 = vmatmul.f32.gmra.mxu1 %v180_v3  ;;  %626 = vmatmul.f32.gmra.mxu2 %v747_v51  ;;  %v2375_v3 = vld [vmem:[%s3681_s1 + $0x330] sm:$0xff] }
  0xd4   : > { %1442 = vmatpush.msra.mxu2 %v2375_v3 }
  0xd5   : > { %840 = vmatmul.f32.gmra.mxu3 %v749_v5 }
  0xd6   : > { %v3086_v6 = vpop.f32.mrf.mxu2  ;;  %v3088_v7 = vpop.f32.mrf.mxu0 }
  0xd8   : > { %v3091_v9 = vpop.f32.mrf.mxu1  ;;  %v3093_v10 = vpop.f32.mrf.mxu3 }
  0xd9   : > { %1054 = vmatmul.f32.gmra.mxu0 %v963_v8  ;;  %v968_v8 = vld [vmem:[%s2698_s19 + $0x93] sm:$0xff] }
  0xdb   : > { %451 = vmatmul.f32.gmra.mxu1 %v181_v11  ;;  %629 = vmatmul.f32.gmra.mxu2 %v748_v60  ;;  %v185_v60 = vld [vmem:[%s2698_s19 + $0x80] sm:$0xff] }
  0xdd   : > { %843 = vmatmul.f32.gmra.mxu3 %v750_v13 }
  0xde   : > { %v3106_v16 = vpop.f32.mrf.mxu2  ;;  %v3108_v17 = vpop.f32.mrf.mxu0 }
  0xe0   : > { %v3111_v19 = vpop.f32.mrf.mxu1  ;;  %v3113_v20 = vpop.f32.mrf.mxu3 }
  0xe1   : > { %1057 = vmatmul.f32.gmra.mxu0 %v964_v18  ;;  %v2359_v18 = vld [vmem:[%s3681_s1 + $0x2b0] sm:$0xff] }
  0xe2   : > { %1228 = vmatpush.msra.mxu1 %v2359_v18 }
  0xe3   : > { %454 = vmatmul.f32.gmra.mxu1 %v182_v21  ;;  %632 = vmatmul.f32.gmra.mxu2 %v749_v5  ;;  %v755_v21 = vld [vmem:[%s2698_s19 + $0x9a] sm:$0xff] }
  0xe5   : > { %846 = vmatmul.f32.gmra.mxu3 %v751_v22 }
  0xe6   : > { %v3120_v24 = vpop.f32.mrf.mxu2  ;;  %v3122_v25 = vpop.f32.mrf.mxu0 }
  0xe8   : > { %v3125_v27 = vpop.f32.mrf.mxu1  ;;  %v3127_v28 = vpop.f32.mrf.mxu3 }
  0xe9   : > { %1060 = vmatmul.f32.gmra.mxu0 %v965_v26 }
  0xeb   : > { %457 = vmatmul.f32.gmra.mxu1 %v183_v29  ;;  %635 = vmatmul.f32.gmra.mxu2 %v750_v13 }
  0xed   : > { %849 = vmatmul.f32.gmra.mxu3 %v752_v30 }
  0xee   : > { %v3137_v34 = vpop.f32.mrf.mxu2  ;;  %v3139_v37 = vpop.f32.mrf.mxu0 }
  0xf0   : > { %v3145_v42 = vpop.f32.mrf.mxu1  ;;  %v3147_v43 = vpop.f32.mrf.mxu3 }
  0xf1   : > { %1063 = vmatmul.f32.gmra.mxu0 %v966_v38 }
  0xf3   : > { %460 = vmatmul.f32.gmra.mxu1 %v184_v46  ;;  %638 = vmatmul.f32.gmra.mxu2 %v751_v22  ;;  %v187_v46 = vld [vmem:[%s2698_s19 + $0x90] sm:$0xff] }
  0xf5   : > { %852 = vmatmul.f32.gmra.mxu3 %v753_v47 }
  0xf6   : > { %v3154_v51 = vpop.f32.mrf.mxu2  ;;  %v3156_v54 = vpop.f32.mrf.mxu0 }
  0xf8   : > { %v3159_v58 = vpop.f32.mrf.mxu3  ;;  %v416_v59 = vpop.f32.mrf.mxu1 }
  0xf9   : > { %1066 = vmatmul.f32.gmra.mxu0 %v967_v55  ;;  %v417_v0 = vadd.f32 %v416_v59, %v3023_v36 }
  0xfb   : > { %463 = vmatmul.f32.gmra.mxu1 %v185_v60  ;;  %641 = vmatmul.f32.gmra.mxu2 %v752_v30  ;;  %v969_v30 = vld [vmem:[%s2698_s19 + $0x9b] sm:$0xff] }
  0xfd   : > { %855 = vmatmul.f32.gmra.mxu3 %v754_v61 }
  0xfe   : > { %v594_v4 = vpop.f32.mrf.mxu2  ;;  %v1022_v5 = vpop.f32.mrf.mxu0 }
  0xff   : > { %v702_v11 = vadd.f32 %v594_v4, %v417_v0  ;;  %v970_v0 = vld [vmem:[%s2698_s19 + $0xa3] sm:$0xff] }
 0x100   : > { %v419_v13 = vpop.f32.mrf.mxu1  ;;  %v808_v14 = vpop.f32.mrf.mxu3  ;;  %v2374_v4 = vld [vmem:[%s3681_s1 + $0x328] sm:$0xff] }
 0x101   : > { %v916_v36 = vadd.f32 %v808_v14, %v702_v11  ;;  %1069 = vmatmul.f32.gmra.mxu0 %v968_v8  ;;  %v420_v23 = vadd.f32 %v419_v13, %v3040_v45  ;;  %v188_v11 = vld [vmem:[%s2698_s19 + $0x98] sm:$0xff]  ;;  %1443 = vmatpush.msra.mxu2 %v2374_v4  ;;  %v2358_v14 = vld [vmem:[%s3681_s1 + $0x2a8] sm:$0xff] }
 0x102   : > { %1229 = vmatpush.msra.mxu1 %v2358_v14 }
 0x103   : > { %v3176_v22 = vadd.f32 %v1022_v5, %v916_v36  ;;  %466 = vmatmul.f32.gmra.mxu1 %v186_v15  ;;  %644 = vmatmul.f32.gmra.mxu2 %v753_v47  ;;  %v756_v47 = vld [vmem:[%s2698_s19 + $0xa2] sm:$0xff] }
 0x105   : > { %858 = vmatmul.f32.gmra.mxu3 %v755_v21 }
 0x106   : > { %v597_v26 = vpop.f32.mrf.mxu2  ;;  %v1025_v29 = vpop.f32.mrf.mxu0 }
 0x107   : > { %v703_v32 = vadd.f32 %v597_v26, %v420_v23  ;;  %v971_v23 = vld [vmem:[%s2698_s19 + $0xab] sm:$0xff] }
 0x108   : > { %v422_v38 = vpop.f32.mrf.mxu1  ;;  %v811_v41 = vpop.f32.mrf.mxu3 }
 0x109   : > { %v917_v50 = vadd.f32 %v811_v41, %v703_v32  ;;  %1072 = vmatmul.f32.gmra.mxu0 %v969_v30  ;;  %v423_v45 = vadd.f32 %v422_v38, %v3054_v53  ;;  %v2390_v53 = vld [vmem:[%s3681_s1 + $0x3a8] sm:$0xff]  ;;  %v189_v32 = vld [vmem:[%s2698_s19 + $0xa0] sm:$0xff]  ;;  %v758_v38 = vld [vmem:[%s2698_s19 + $0xb2] sm:$0xff] }
 0x10a   : > { %1657 = vmatpush.msra.mxu3 %v2390_v53 }
 0x10b   : > { %v3185_v55 = vadd.f32 %v1025_v29, %v917_v50  ;;  %469 = vmatmul.f32.gmra.mxu1 %v187_v46  ;;  %647 = vmatmul.f32.gmra.mxu2 %v754_v61  ;;  %v757_v61 = vld [vmem:[%s2698_s19 + $0xaa] sm:$0xff] }
 0x10d   : > { %861 = vmatmul.f32.gmra.mxu3 %v756_v47 }
 0x10e   : > { %v600_v59 = vpop.f32.mrf.mxu2  ;;  %v1028_v60 = vpop.f32.mrf.mxu0 }
 0x10f   : > { %v704_v3 = vadd.f32 %v600_v59, %v423_v45  ;;  %v972_v45 = vld [vmem:[%s2698_s19 + $0xb3] sm:$0xff] }
 0x110   : > { %v425_v5 = vpop.f32.mrf.mxu1  ;;  %v814_v8 = vpop.f32.mrf.mxu3 }
 0x111   : > { %v918_v12 = vadd.f32 %v814_v8, %v704_v3  ;;  %1075 = vmatmul.f32.gmra.mxu0 %v970_v0  ;;  %v426_v15 = vadd.f32 %v425_v5, %v3074_v63  ;;  %v190_v3 = vld [vmem:[%s2698_s19 + $0xa8] sm:$0xff]  ;;  %v2373_v5 = vld [vmem:[%s3681_s1 + $0x320] sm:$0xff] }
 0x112   : > { %v759_v8 = vld [vmem:[%s2698_s19 + $0xba] sm:$0xff]  ;;  %1444 = vmatpush.msra.mxu2 %v2373_v5 }
 0x113   : > { %v3197_v13 = vadd.f32 %v1028_v60, %v918_v12  ;;  %472 = vmatmul.f32.gmra.mxu1 %v188_v11  ;;  %650 = vmatmul.f32.gmra.mxu2 %v755_v21  ;;  %v2406_v21 = vld [vmem:[%s3681_s1 + $0x428] sm:$0xff]  ;;  %v2357_v12 = vld [vmem:[%s3681_s1 + $0x2a0] sm:$0xff] }
 0x114   : > { %1871 = vmatpush.msra.mxu0 %v2406_v21  ;;  %1230 = vmatpush.msra.mxu1 %v2357_v12 }
 0x115   : > { %864 = vmatmul.f32.gmra.mxu3 %v757_v61 }
 0x116   : > { %v603_v36 = vpop.f32.mrf.mxu2  ;;  %v1031_v18 = vpop.f32.mrf.mxu0 }
 0x117   : > { %v705_v26 = vadd.f32 %v603_v36, %v426_v15  ;;  %v973_v15 = vld [vmem:[%s2698_s19 + $0xbb] sm:$0xff] }
 0x118   : > { %v428_v29 = vpop.f32.mrf.mxu1  ;;  %v817_v30 = vpop.f32.mrf.mxu3 }
 0x119   : > { %v919_v33 = vadd.f32 %v817_v30, %v705_v26  ;;  %1078 = vmatmul.f32.gmra.mxu0 %v971_v23  ;;  %v429_v41 = vadd.f32 %v428_v29, %v3088_v7  ;;  %v2389_v7 = vld [vmem:[%s3681_s1 + $0x3a0] sm:$0xff]  ;;  %v191_v23 = vld [vmem:[%s2698_s19 + $0xb0] sm:$0xff] }
 0x11a   : > { %1658 = vmatpush.msra.mxu3 %v2389_v7  ;;  %v760_v29 = vld [vmem:[%s2698_s19 + $0xc2] sm:$0xff] }
 0x11b   : > { %v3209_v63 = vadd.f32 %v1031_v18, %v919_v33  ;;  %475 = vmatmul.f32.gmra.mxu1 %v189_v32  ;;  %653 = vmatmul.f32.gmra.mxu2 %v756_v47 }
 0x11d   : > { %867 = vmatmul.f32.gmra.mxu3 %v758_v38 }
 0x11e   : > { %v606_v46 = vpop.f32.mrf.mxu2  ;;  %v1034_v50 = vpop.f32.mrf.mxu0 }
 0x11f   : > { %v706_v59 = vadd.f32 %v606_v46, %v429_v41  ;;  %v974_v41 = vld [vmem:[%s2698_s19 + $0xc3] sm:$0xff] }
 0x120   : > { %v431_v60 = vpop.f32.mrf.mxu1  ;;  %v820_v0 = vpop.f32.mrf.mxu3 }
 0x121   : > { %v920_v4 = vadd.f32 %v820_v0, %v706_v59  ;;  %1081 = vmatmul.f32.gmra.mxu0 %v972_v45  ;;  %v432_v11 = vadd.f32 %v431_v60, %v3108_v17  ;;  %v2405_v17 = vld [vmem:[%s3681_s1 + $0x420] sm:$0xff]  ;;  %v192_v59 = vld [vmem:[%s2698_s19 + $0xb8] sm:$0xff]  ;;  %v761_v0 = vld [vmem:[%s2698_s19 + $0xca] sm:$0xff] }
 0x122   : > { %1872 = vmatpush.msra.mxu0 %v2405_v17 }
 0x123   : > { %v3218_v47 = vadd.f32 %v1034_v50, %v920_v4  ;;  %478 = vmatmul.f32.gmra.mxu1 %v190_v3  ;;  %656 = vmatmul.f32.gmra.mxu2 %v757_v61  ;;  %v2388_v4 = vld [vmem:[%s3681_s1 + $0x398] sm:$0xff] }
 0x124   : > { %1659 = vmatpush.msra.mxu3 %v2388_v4 }
 0x125   : > { %870 = vmatmul.f32.gmra.mxu3 %v759_v8 }
 0x126   : > { %v609_v53 = vpop.f32.mrf.mxu2  ;;  %v1037_v14 = vpop.f32.mrf.mxu0 }
 0x127   : > { %v707_v36 = vadd.f32 %v609_v53, %v432_v11  ;;  %v975_v11 = vld [vmem:[%s2698_s19 + $0xcb] sm:$0xff] }
 0x128   : > { %v434_v61 = vpop.f32.mrf.mxu1  ;;  %v823_v18 = vpop.f32.mrf.mxu3 }
 0x129   : > { %v921_v26 = vadd.f32 %v823_v18, %v707_v36  ;;  %1084 = vmatmul.f32.gmra.mxu0 %v973_v15  ;;  %v435_v32 = vadd.f32 %v434_v61, %v3122_v25  ;;  %v2372_v25 = vld [vmem:[%s3681_s1 + $0x318] sm:$0xff]  ;;  %v193_v15 = vld [vmem:[%s2698_s19 + $0xc0] sm:$0xff] }
 0x12a   : > { %1445 = vmatpush.msra.mxu2 %v2372_v25  ;;  %v762_v36 = vld [vmem:[%s2698_s19 + $0xd2] sm:$0xff] }
 0x12b   : > { %v3230_v30 = vadd.f32 %v1037_v14, %v921_v26  ;;  %481 = vmatmul.f32.gmra.mxu1 %v191_v23  ;;  %659 = vmatmul.f32.gmra.mxu2 %v758_v38  ;;  %v2404_v23 = vld [vmem:[%s3681_s1 + $0x418] sm:$0xff] }
 0x12c   : > { %1873 = vmatpush.msra.mxu0 %v2404_v23 }
 0x12d   : > { %873 = vmatmul.f32.gmra.mxu3 %v760_v29 }
 0x12e   : > { %v612_v33 = vpop.f32.mrf.mxu2  ;;  %v1040_v21 = vpop.f32.mrf.mxu0 }
 0x12f   : > { %v708_v46 = vadd.f32 %v612_v33, %v435_v32  ;;  %v976_v32 = vld [vmem:[%s2698_s19 + $0xd3] sm:$0xff] }
 0x130   : > { %v437_v50 = vpop.f32.mrf.mxu1  ;;  %v826_v45 = vpop.f32.mrf.mxu3 }
 0x131   : > { %v922_v60 = vadd.f32 %v826_v45, %v708_v46  ;;  %1087 = vmatmul.f32.gmra.mxu0 %v974_v41  ;;  %v438_v3 = vadd.f32 %v437_v50, %v3139_v37  ;;  %v194_v46 = vld [vmem:[%s2698_s19 + $0xc8] sm:$0xff] }
 0x133   : > { %v3239_v38 = vadd.f32 %v1040_v21, %v922_v60  ;;  %484 = vmatmul.f32.gmra.mxu1 %v192_v59  ;;  %662 = vmatmul.f32.gmra.mxu2 %v759_v8  ;;  %v2356_v8 = vld [vmem:[%s3681_s1 + $0x298] sm:$0xff]  ;;  %v2371_v59 = vld [vmem:[%s3681_s1 + $0x310] sm:$0xff] }
 0x134   : > { %1231 = vmatpush.msra.mxu1 %v2356_v8  ;;  %1446 = vmatpush.msra.mxu2 %v2371_v59  ;;  %v764_v8 = vld [vmem:[%s2698_s19 + $0xe2] sm:$0xff] }
 0x135   : > { %876 = vmatmul.f32.gmra.mxu3 %v761_v0 }
 0x136   : > { %v615_v5 = vpop.f32.mrf.mxu2  ;;  %v1043_v7 = vpop.f32.mrf.mxu0 }
 0x137   : > { %v709_v12 = vadd.f32 %v615_v5, %v438_v3  ;;  %v977_v3 = vld [vmem:[%s2698_s19 + $0xdb] sm:$0xff]  ;;  %v2387_v5 = vld [vmem:[%s3681_s1 + $0x390] sm:$0xff] }
 0x138   : > { %v440_v53 = vpop.f32.mrf.mxu1  ;;  %v829_v14 = vpop.f32.mrf.mxu3  ;;  %1660 = vmatpush.msra.mxu3 %v2387_v5 }
 0x139   : > { %v923_v37 = vadd.f32 %v829_v14, %v709_v12  ;;  %1090 = vmatmul.f32.gmra.mxu0 %v975_v11  ;;  %v441_v18 = vadd.f32 %v440_v53, %v3156_v54  ;;  %v195_v11 = vld [vmem:[%s2698_s19 + $0xd0] sm:$0xff] }
 0x13a   : > { %v2355_v12 = vld [vmem:[%s3681_s1 + $0x290] sm:$0xff] }
 0x13b   : > { %v3254_v61 = vadd.f32 %v1043_v7, %v923_v37  ;;  %487 = vmatmul.f32.gmra.mxu1 %v193_v15  ;;  %665 = vmatmul.f32.gmra.mxu2 %v760_v29  ;;  %v763_v29 = vld [vmem:[%s2698_s19 + $0xda] sm:$0xff] }
 0x13c   : > { %1232 = vmatpush.msra.mxu1 %v2355_v12 }
 0x13d   : > { %879 = vmatmul.f32.gmra.mxu3 %v762_v36 }
 0x13e   : > { %v618_v26 = vpop.f32.mrf.mxu2  ;;  %v1046_v17 = vpop.f32.mrf.mxu0 }
 0x13f   : > { %v710_v33 = vadd.f32 %v618_v26, %v441_v18  ;;  %v978_v18 = vld [vmem:[%s2698_s19 + $0xe3] sm:$0xff]  ;;  %v2403_v26 = vld [vmem:[%s3681_s1 + $0x410] sm:$0xff] }
 0x140   : > { %v443_v21 = vpop.f32.mrf.mxu1  ;;  %v832_v41 = vpop.f32.mrf.mxu3  ;;  %1874 = vmatpush.msra.mxu0 %v2403_v26 }
 0x141   : > { %v924_v50 = vadd.f32 %v832_v41, %v710_v33  ;;  %1093 = vmatmul.f32.gmra.mxu0 %v976_v32  ;;  %v444_v54 = vadd.f32 %v443_v21, %v3014_v31  ;;  %v196_v33 = vld [vmem:[%s2698_s19 + $0xd8] sm:$0xff] }
 0x143   : > { %v3263_v45 = vadd.f32 %v1046_v17, %v924_v50  ;;  %490 = vmatmul.f32.gmra.mxu1 %v194_v46  ;;  %668 = vmatmul.f32.gmra.mxu2 %v761_v0 }
 0x145   : > { %882 = vmatmul.f32.gmra.mxu3 %v763_v29 }
 0x146   : > { %v621_v60 = vpop.f32.mrf.mxu2  ;;  %v1049_v25 = vpop.f32.mrf.mxu0 }
 0x147   : > { %v711_v4 = vadd.f32 %v621_v60, %v444_v54  ;;  %v979_v54 = vld [vmem:[%s2698_s19 + $0xeb] sm:$0xff] }
 0x148   : > { %v446_v7 = vpop.f32.mrf.mxu1  ;;  %v835_v0 = vpop.f32.mrf.mxu3  ;;  %v2370_v60 = vld [vmem:[%s3681_s1 + $0x308] sm:$0xff] }
 0x149   : > { %v925_v31 = vadd.f32 %v835_v0, %v711_v4  ;;  %1096 = vmatmul.f32.gmra.mxu0 %v977_v3  ;;  %v447_v14 = vadd.f32 %v446_v7, %v3029_v39  ;;  %v197_v4 = vld [vmem:[%s2698_s19 + $0xe0] sm:$0xff]  ;;  %1447 = vmatpush.msra.mxu2 %v2370_v60  ;;  %v2354_v0 = vld [vmem:[%s3681_s1 + $0x288] sm:$0xff] }
 0x14a   : > { %1233 = vmatpush.msra.mxu1 %v2354_v0 }
 0x14b   : > { %v3278_v53 = vadd.f32 %v1049_v25, %v925_v31  ;;  %493 = vmatmul.f32.gmra.mxu1 %v195_v11  ;;  %671 = vmatmul.f32.gmra.mxu2 %v762_v36  ;;  %v765_v36 = vld [vmem:[%s2698_s19 + $0xea] sm:$0xff] }
 0x14d   : > { %885 = vmatmul.f32.gmra.mxu3 %v764_v8 }
 0x14e   : > { %v624_v15 = vpop.f32.mrf.mxu2  ;;  %v1052_v37 = vpop.f32.mrf.mxu0 }
 0x14f   : > { %v712_v23 = vadd.f32 %v624_v15, %v447_v14  ;;  %v980_v14 = vld [vmem:[%s2698_s19 + $0xf3] sm:$0xff] }
 0x150   : > { %v449_v17 = vpop.f32.mrf.mxu1  ;;  %v838_v32 = vpop.f32.mrf.mxu3 }
 0x151   : > { %v926_v21 = vadd.f32 %v838_v32, %v712_v23  ;;  %1099 = vmatmul.f32.gmra.mxu0 %v978_v18  ;;  %v450_v39 = vadd.f32 %v449_v17, %v3046_v48  ;;  %v2386_v48 = vld [vmem:[%s3681_s1 + $0x388] sm:$0xff]  ;;  %v767_v17 = vld [vmem:[%s2698_s19 + $0xfa] sm:$0xff] }
 0x152   : > { %1661 = vmatpush.msra.mxu3 %v2386_v48  ;;  %v198_v23 = vld [vmem:[%s2698_s19 + $0xe8] sm:$0xff] }
 0x153   : > { %v3287_v41 = vadd.f32 %v1052_v37, %v926_v21  ;;  %496 = vmatmul.f32.gmra.mxu1 %v196_v33  ;;  %674 = vmatmul.f32.gmra.mxu2 %v763_v29  ;;  %v766_v29 = vld [vmem:[%s2698_s19 + $0xf2] sm:$0xff] }
 0x155   : > { %888 = vmatmul.f32.gmra.mxu3 %v765_v36 }
 0x156   : > { %v627_v46 = vpop.f32.mrf.mxu2  ;;  %v1055_v50 = vpop.f32.mrf.mxu0 }
 0x157   : > { %v713_v59 = vadd.f32 %v627_v46, %v450_v39  ;;  %v981_v39 = vld [vmem:[%s2698_s19 + $0xfb] sm:$0xff] }
 0x158   : > { %v452_v25 = vpop.f32.mrf.mxu1  ;;  %v841_v3 = vpop.f32.mrf.mxu3 }
 0x159   : > { %v927_v5 = vadd.f32 %v841_v3, %v713_v59  ;;  %1102 = vmatmul.f32.gmra.mxu0 %v979_v54  ;;  %v453_v11 = vadd.f32 %v452_v25, %v3060_v56  ;;  %v199_v59 = vld [vmem:[%s2698_s19 + $0xf0] sm:$0xff]  ;;  %v2369_v25 = vld [vmem:[%s3681_s1 + $0x300] sm:$0xff] }
 0x15a   : > { %v768_v3 = vld [vmem:[%s2698_s19 + $0x102] sm:$0xff]  ;;  %1448 = vmatpush.msra.mxu2 %v2369_v25  ;;  %v984_v25 = vld [vmem:[%s2698_s19 + $0x113] sm:$0xff] }
 0x15b   : > { %v3299_v7 = vadd.f32 %v1055_v50, %v927_v5  ;;  %499 = vmatmul.f32.gmra.mxu1 %v197_v4  ;;  %677 = vmatmul.f32.gmra.mxu2 %v764_v8  ;;  %v2402_v8 = vld [vmem:[%s3681_s1 + $0x408] sm:$0xff]  ;;  %v2353_v5 = vld [vmem:[%s3681_s1 + $0x280] sm:$0xff] }
 0x15c   : > { %1875 = vmatpush.msra.mxu0 %v2402_v8  ;;  %1234 = vmatpush.msra.mxu1 %v2353_v5 }
 0x15d   : > { %891 = vmatmul.f32.gmra.mxu3 %v766_v29 }
 0x15e   : > { %v630_v31 = vpop.f32.mrf.mxu2  ;;  %v1058_v12 = vpop.f32.mrf.mxu0 }
 0x15f   : > { %v714_v15 = vadd.f32 %v630_v31, %v453_v11  ;;  %v982_v11 = vld [vmem:[%s2698_s19 + $0x103] sm:$0xff] }
 0x160   : > { %v455_v37 = vpop.f32.mrf.mxu1  ;;  %v844_v18 = vpop.f32.mrf.mxu3 }
 0x161   : > { %v928_v26 = vadd.f32 %v844_v18, %v714_v15  ;;  %1105 = vmatmul.f32.gmra.mxu0 %v980_v14  ;;  %v456_v32 = vadd.f32 %v455_v37, %v3077_v1  ;;  %v2385_v1 = vld [vmem:[%s3681_s1 + $0x380] sm:$0xff]  ;;  %v200_v14 = vld [vmem:[%s2698_s19 + $0xf8] sm:$0xff]  ;;  %v769_v37 = vld [vmem:[%s2698_s19 + $0x10a] sm:$0xff] }
 0x162   : > { %1662 = vmatpush.msra.mxu3 %v2385_v1 }
 0x163   : > { %v3311_v56 = vadd.f32 %v1058_v12, %v928_v26  ;;  %502 = vmatmul.f32.gmra.mxu1 %v198_v23  ;;  %680 = vmatmul.f32.gmra.mxu2 %v765_v36 }
 0x165   : > { %894 = vmatmul.f32.gmra.mxu3 %v767_v17 }
 0x166   : > { %v633_v33 = vpop.f32.mrf.mxu2  ;;  %v1061_v21 = vpop.f32.mrf.mxu0 }
 0x167   : > { %v715_v46 = vadd.f32 %v633_v33, %v456_v32  ;;  %v983_v32 = vld [vmem:[%s2698_s19 + $0x10b] sm:$0xff] }
 0x168   : > { %v458_v50 = vpop.f32.mrf.mxu1  ;;  %v847_v54 = vpop.f32.mrf.mxu3 }
 0x169   : > { %v929_v60 = vadd.f32 %v847_v54, %v715_v46  ;;  %1108 = vmatmul.f32.gmra.mxu0 %v981_v39  ;;  %v459_v4 = vadd.f32 %v458_v50, %v3091_v9  ;;  %v2401_v9 = vld [vmem:[%s3681_s1 + $0x400] sm:$0xff] }
 0x16a   : > { %1876 = vmatpush.msra.mxu0 %v2401_v9  ;;  %v201_v46 = vld [vmem:[%s2698_s19 + $0x100] sm:$0xff] }
 0x16b   : > { %v3320_v36 = vadd.f32 %v1061_v21, %v929_v60  ;;  %505 = vmatmul.f32.gmra.mxu1 %v199_v59  ;;  %683 = vmatmul.f32.gmra.mxu2 %v766_v29 }
 0x16d   : > { %897 = vmatmul.f32.gmra.mxu3 %v768_v3 }
 0x16e   : > { %v636_v48 = vpop.f32.mrf.mxu2  ;;  %v1064_v0 = vpop.f32.mrf.mxu0 }
 0x16f   : > { %v716_v31 = vadd.f32 %v636_v48, %v459_v4  ;;  %v202_v48 = vld [vmem:[%s2698_s19 + $0x108] sm:$0xff] }
 0x170   : > { %v461_v29 = vpop.f32.mrf.mxu1  ;;  %v850_v12 = vpop.f32.mrf.mxu3 }
 0x171   : > { %v930_v15 = vadd.f32 %v850_v12, %v716_v31  ;;  %1111 = vmatmul.f32.gmra.mxu0 %v982_v11  ;;  %v462_v23 = vadd.f32 %v461_v29, %v3111_v19  ;;  %v771_v11 = vld [vmem:[%s2698_s19 + $0x11a] sm:$0xff] }
 0x172   : > { %v985_v12 = vld [vmem:[%s2698_s19 + $0x11b] sm:$0xff] }
 0x173   : > { %v3332_v18 = vadd.f32 %v1064_v0, %v930_v15  ;;  %508 = vmatmul.f32.gmra.mxu1 %v200_v14  ;;  %686 = vmatmul.f32.gmra.mxu2 %v767_v17  ;;  %v770_v17 = vld [vmem:[%s2698_s19 + $0x112] sm:$0xff] }
 0x175   : > { %900 = vmatmul.f32.gmra.mxu3 %v769_v37 }
 0x176   : > { %v639_v26 = vpop.f32.mrf.mxu2  ;;  %v1067_v8 = vpop.f32.mrf.mxu0 }
 0x177   : > { %v717_v33 = vadd.f32 %v639_v26, %v462_v23  ;;  %v203_v23 = vld [vmem:[%s2698_s19 + $0x110] sm:$0xff] }
 0x178   : > { %v464_v21 = vpop.f32.mrf.mxu1  ;;  %v853_v39 = vpop.f32.mrf.mxu3 }
 0x179   : > { %v931_v50 = vadd.f32 %v853_v39, %v717_v33  ;;  %1114 = vmatmul.f32.gmra.mxu0 %v983_v32  ;;  %v465_v19 = vadd.f32 %v464_v21, %v3125_v27  ;;  %v986_v21 = vld [vmem:[%s2698_s19 + $0x123] sm:$0xff] }
 0x17b   : > { %v3341_v54 = vadd.f32 %v1067_v8, %v931_v50  ;;  %511 = vmatmul.f32.gmra.mxu1 %v201_v46  ;;  %689 = vmatmul.f32.gmra.mxu2 %v768_v3  ;;  %v772_v8 = vld [vmem:[%s2698_s19 + $0x122] sm:$0xff] }
 0x17d   : > { %903 = vmatmul.f32.gmra.mxu3 %v770_v17 }
 0x17e   : > { %v642_v59 = vpop.f32.mrf.mxu2  ;;  %v1070_v60 = vpop.f32.mrf.mxu0 }
 0x17f   : > { %v718_v1 = vadd.f32 %v642_v59, %v465_v19  ;;  %v204_v19 = vld [vmem:[%s2698_s19 + $0x118] sm:$0xff] }
 0x180   : > { %v467_v4 = vpop.f32.mrf.mxu1  ;;  %v856_v5 = vpop.f32.mrf.mxu3 }
 0x181   : > { %v932_v0 = vadd.f32 %v856_v5, %v718_v1  ;;  %1117 = vmatmul.f32.gmra.mxu0 %v984_v25  ;;  %v468_v27 = vadd.f32 %v467_v4, %v3145_v42  ;;  %v987_v4 = vld [vmem:[%s2698_s19 + $0x12b] sm:$0xff] }
 0x183   : > { %v3347_v31 = vadd.f32 %v1070_v60, %v932_v0  ;;  %514 = vmatmul.f32.gmra.mxu1 %v202_v48  ;;  %692 = vmatmul.f32.gmra.mxu2 %v769_v37  ;;  %v773_v60 = vld [vmem:[%s2698_s19 + $0x12a] sm:$0xff] }
 0x185   : > { %906 = vmatmul.f32.gmra.mxu3 %v771_v11 }
 0x186   : > { %v645_v3 = vpop.f32.mrf.mxu2  ;;  %v1073_v29 = vpop.f32.mrf.mxu0 }
 0x187   : > { %v719_v14 = vadd.f32 %v645_v3, %v468_v27  ;;  %v1166_v27 = vld [vmem:[%s2698_s19 + $0x14] sm:$0xff]  ;;  %v1380_v3 = vld [vmem:[%s2698_s19 + $0x24] sm:$0xff] }
 0x188   : > { %v470_v15 = vpop.f32.mrf.mxu1  ;;  %v859_v9 = vpop.f32.mrf.mxu3 }
 0x189   : > { %v933_v26 = vadd.f32 %v859_v9, %v719_v14  ;;  %1120 = vmatmul.f32.gmra.mxu0 %v985_v12  ;;  %v471_v42 = vadd.f32 %v470_v15, %v3021_v35  ;;  %v1594_v12 = vld [vmem:[%s2698_s19 + $0x25] sm:$0xff] }
 0x18a   : > { %v1808_v9 = vld [vmem:[%s2698_s19 + $0x26] sm:$0xff] }
 0x18b   : > { %v3353_v32 = vadd.f32 %v1073_v29, %v933_v26  ;;  %517 = vmatmul.f32.gmra.mxu1 %v203_v23  ;;  %695 = vmatmul.f32.gmra.mxu2 %v770_v17 }
 0x18d   : > { %909 = vmatmul.f32.gmra.mxu3 %v772_v8 }
 0x18e   : > { %v648_v37 = vpop.f32.mrf.mxu2  ;;  %v1076_v33 = vpop.f32.mrf.mxu0 }
 0x18f   : > { %v720_v39 = vadd.f32 %v648_v37, %v471_v42  ;;  %v1167_v42 = vld [vmem:[%s2698_s19 + $0x1c] sm:$0xff]  ;;  %v1381_v37 = vld [vmem:[%s2698_s19 + $0x2c] sm:$0xff] }
 0x190   : > { %v473_v46 = vpop.f32.mrf.mxu1  ;;  %v862_v50 = vpop.f32.mrf.mxu3 }
 0x191   : > { %v934_v59 = vadd.f32 %v862_v50, %v720_v39  ;;  %1123 = vmatmul.f32.gmra.mxu0 %v986_v21  ;;  %v474_v35 = vadd.f32 %v473_v46, %v3038_v44  ;;  %v1595_v21 = vld [vmem:[%s2698_s19 + $0x2d] sm:$0xff] }
 0x193   : > { %v3359_v25 = vadd.f32 %v1076_v33, %v934_v59  ;;  %520 = vmatmul.f32.gmra.mxu1 %v204_v19  ;;  %698 = vmatmul.f32.gmra.mxu2 %v771_v11  ;;  %v1809_v19 = vld [vmem:[%s2698_s19 + $0x2e] sm:$0xff] }
 0x195   : > { %912 = vmatmul.f32.gmra.mxu3 %v773_v60 }
 0x196   : > { %v651_v17 = vpop.f32.mrf.mxu2  ;;  %v1079_v1 = vpop.f32.mrf.mxu0 }
 0x197   : > { %v721_v5 = vadd.f32 %v651_v17, %v474_v35  ;;  %v1382_v17 = vld [vmem:[%s2698_s19 + $0x34] sm:$0xff] }
 0x198   : > { %v476_v48 = vpop.f32.mrf.mxu1  ;;  %v865_v0 = vpop.f32.mrf.mxu3 }
 0x199   : > { %v935_v29 = vadd.f32 %v865_v0, %v721_v5  ;;  %1126 = vmatmul.f32.gmra.mxu0 %v987_v4  ;;  %v477_v44 = vadd.f32 %v476_v48, %v3052_v52  ;;  %v1596_v4 = vld [vmem:[%s2698_s19 + $0x35] sm:$0xff] }
 0x19b   : > { %v3366_v14 = vadd.f32 %v1079_v1, %v935_v29  ;;  %1235 = vmatmul.f32.vlgmr.msra.gmra.mxu1 %v1166_v27  ;;  %1449 = vmatmul.f32.vlgmr.msra.gmra.mxu2 %v1380_v3  ;;  %v1810_v27 = vld [vmem:[%s2698_s19 + $0x36] sm:$0xff] }
 0x19d   : > { %1663 = vmatmul.f32.vlgmr.msra.gmra.mxu3 %v1594_v12 }
 0x19e   : > { %v654_v11 = vpop.f32.mrf.mxu2  ;;  %v1082_v15 = vpop.f32.mrf.mxu0 }
 0x19f   : > { %v722_v23 = vadd.f32 %v654_v11, %v477_v44  ;;  %v1383_v11 = vld [vmem:[%s2698_s19 + $0x3c] sm:$0xff] }
 0x1a0   : > { %v479_v26 = vpop.f32.mrf.mxu1  ;;  %v868_v8 = vpop.f32.mrf.mxu3 }
 0x1a1   : > { %v936_v33 = vadd.f32 %v868_v8, %v722_v23  ;;  %1877 = vmatmul.f32.vlgmr.msra.gmra.mxu0 %v1808_v9  ;;  %v480_v52 = vadd.f32 %v479_v26, %v3072_v62  ;;  %v1597_v9 = vld [vmem:[%s2698_s19 + $0x3d] sm:$0xff] }
 0x1a2   : > { %v1811_v8 = vld [vmem:[%s2698_s19 + $0x3e] sm:$0xff] }
 0x1a3   : > { %v3373_v39 = vadd.f32 %v1082_v15, %v936_v33  ;;  %1238 = vmatmul.f32.gmra.mxu1 %v1167_v42  ;;  %1452 = vmatmul.f32.gmra.mxu2 %v1381_v37 }
 0x1a5   : > { %1666 = vmatmul.f32.gmra.mxu3 %v1595_v21 }
 0x1a6   : > { %v657_v46 = vpop.f32.mrf.mxu2  ;;  %v1085_v50 = vpop.f32.mrf.mxu0 }
 0x1a7   : > { %v723_v59 = vadd.f32 %v657_v46, %v480_v52  ;;  %v1384_v52 = vld [vmem:[%s2698_s19 + $0x44] sm:$0xff] }
 0x1a8   : > { %v482_v60 = vpop.f32.mrf.mxu1  ;;  %v871_v35 = vpop.f32.mrf.mxu3 }
 0x1a9   : > { %v937_v1 = vadd.f32 %v871_v35, %v723_v59  ;;  %1880 = vmatmul.f32.gmra.mxu0 %v1809_v19  ;;  %v483_v62 = vadd.f32 %v482_v60, %v3086_v6  ;;  %v1812_v60 = vld [vmem:[%s2698_s19 + $0x46] sm:$0xff] }
 0x1ab   : > { %v3379_v5 = vadd.f32 %v1085_v50, %v937_v1  ;;  %1241 = vmatmul.f32.gmra.mxu1 %v1380_v3  ;;  %1455 = vmatmul.f32.gmra.mxu2 %v1382_v17  ;;  %v1598_v50 = vld [vmem:[%s2698_s19 + $0x45] sm:$0xff] }
 0x1ad   : > { %1669 = vmatmul.f32.gmra.mxu3 %v1596_v4 }
 0x1ae   : > { %v660_v48 = vpop.f32.mrf.mxu2  ;;  %v1088_v0 = vpop.f32.mrf.mxu0 }
 0x1af   : > { %v724_v29 = vadd.f32 %v660_v48, %v483_v62  ;;  %v1385_v62 = vld [vmem:[%s2698_s19 + $0x4c] sm:$0xff] }
 0x1b0   : > { %v485_v12 = vpop.f32.mrf.mxu1  ;;  %v874_v44 = vpop.f32.mrf.mxu3 }
 0x1b1   : > { %v938_v15 = vadd.f32 %v874_v44, %v724_v29  ;;  %1883 = vmatmul.f32.gmra.mxu0 %v1810_v27  ;;  %v486_v6 = vadd.f32 %v485_v12, %v3106_v16  ;;  %v1813_v12 = vld [vmem:[%s2698_s19 + $0x4e] sm:$0xff] }
 0x1b3   : > { %v3385_v23 = vadd.f32 %v1088_v0, %v938_v15  ;;  %1244 = vmatmul.f32.gmra.mxu1 %v1381_v37  ;;  %1458 = vmatmul.f32.gmra.mxu2 %v1383_v11  ;;  %v1599_v0 = vld [vmem:[%s2698_s19 + $0x4d] sm:$0xff] }
 0x1b5   : > { %1672 = vmatmul.f32.gmra.mxu3 %v1597_v9 }
 0x1b6   : > { %v663_v3 = vpop.f32.mrf.mxu2  ;;  %v1091_v26 = vpop.f32.mrf.mxu0 }
 0x1b7   : > { %v725_v42 = vadd.f32 %v663_v3, %v486_v6  ;;  %v1386_v6 = vld [vmem:[%s2698_s19 + $0x54] sm:$0xff] }
 0x1b8   : > { %v488_v33 = vpop.f32.mrf.mxu1  ;;  %v877_v21 = vpop.f32.mrf.mxu3 }
 0x1b9   : > { %v939_v46 = vadd.f32 %v877_v21, %v725_v42  ;;  %1886 = vmatmul.f32.gmra.mxu0 %v1811_v8  ;;  %v489_v16 = vadd.f32 %v488_v33, %v3120_v24  ;;  %v1814_v33 = vld [vmem:[%s2698_s19 + $0x56] sm:$0xff] }
 0x1bb   : > { %v3391_v19 = vadd.f32 %v1091_v26, %v939_v46  ;;  %1247 = vmatmul.f32.gmra.mxu1 %v1382_v17  ;;  %1461 = vmatmul.f32.gmra.mxu2 %v1384_v52  ;;  %v1600_v26 = vld [vmem:[%s2698_s19 + $0x55] sm:$0xff] }
 0x1bd   : > { %1675 = vmatmul.f32.gmra.mxu3 %v1598_v50 }
 0x1be   : > { %v666_v37 = vpop.f32.mrf.mxu2  ;;  %v1094_v59 = vpop.f32.mrf.mxu0 }
 0x1bf   : > { %v726_v35 = vadd.f32 %v666_v37, %v489_v16  ;;  %v1387_v16 = vld [vmem:[%s2698_s19 + $0x5c] sm:$0xff] }
 0x1c0   : > { %v491_v1 = vpop.f32.mrf.mxu1  ;;  %v880_v4 = vpop.f32.mrf.mxu3 }
 0x1c1   : > { %v940_v48 = vadd.f32 %v880_v4, %v726_v35  ;;  %1889 = vmatmul.f32.gmra.mxu0 %v1812_v60  ;;  %v492_v24 = vadd.f32 %v491_v1, %v3137_v34  ;;  %v1815_v1 = vld [vmem:[%s2698_s19 + $0x5e] sm:$0xff] }
 0x1c3   : > { %v3397_v27 = vadd.f32 %v1094_v59, %v940_v48  ;;  %1250 = vmatmul.f32.gmra.mxu1 %v1383_v11  ;;  %1464 = vmatmul.f32.gmra.mxu2 %v1385_v62  ;;  %v1601_v59 = vld [vmem:[%s2698_s19 + $0x5d] sm:$0xff] }
 0x1c5   : > { %1678 = vmatmul.f32.gmra.mxu3 %v1599_v0 }
 0x1c6   : > { %v669_v17 = vpop.f32.mrf.mxu2  ;;  %v1097_v29 = vpop.f32.mrf.mxu0 }
 0x1c7   : > { %v727_v44 = vadd.f32 %v669_v17, %v492_v24  ;;  %v1388_v24 = vld [vmem:[%s2698_s19 + $0x64] sm:$0xff] }
 0x1c8   : > { %v494_v15 = vpop.f32.mrf.mxu1  ;;  %v883_v9 = vpop.f32.mrf.mxu3 }
 0x1c9   : > { %v941_v3 = vadd.f32 %v883_v9, %v727_v44  ;;  %1892 = vmatmul.f32.gmra.mxu0 %v1813_v12  ;;  %v495_v34 = vadd.f32 %v494_v15, %v3154_v51  ;;  %v1816_v15 = vld [vmem:[%s2698_s19 + $0x66] sm:$0xff] }
 0x1cb   : > { %v3403_v8 = vadd.f32 %v1097_v29, %v941_v3  ;;  %1253 = vmatmul.f32.gmra.mxu1 %v1384_v52  ;;  %1467 = vmatmul.f32.gmra.mxu2 %v1386_v6  ;;  %v1602_v29 = vld [vmem:[%s2698_s19 + $0x65] sm:$0xff] }
 0x1cd   : > { %1681 = vmatmul.f32.gmra.mxu3 %v1600_v26 }
 0x1ce   : > { %v672_v11 = vpop.f32.mrf.mxu2  ;;  %v1100_v42 = vpop.f32.mrf.mxu0 }
 0x1cf   : > { %v728_v21 = vadd.f32 %v672_v11, %v495_v34  ;;  %v1389_v34 = vld [vmem:[%s2698_s19 + $0x6c] sm:$0xff] }
 0x1d0   : > { %v497_v46 = vpop.f32.mrf.mxu1  ;;  %v886_v50 = vpop.f32.mrf.mxu3 }
 0x1d1   : > { %v942_v37 = vadd.f32 %v886_v50, %v728_v21  ;;  %1895 = vmatmul.f32.gmra.mxu0 %v1814_v33  ;;  %v498_v51 = vadd.f32 %v497_v46, %v3031_v40  ;;  %v1817_v46 = vld [vmem:[%s2698_s19 + $0x6e] sm:$0xff] }
 0x1d3   : > { %v3409_v60 = vadd.f32 %v1100_v42, %v942_v37  ;;  %1256 = vmatmul.f32.gmra.mxu1 %v1385_v62  ;;  %1470 = vmatmul.f32.gmra.mxu2 %v1387_v16  ;;  %v1603_v42 = vld [vmem:[%s2698_s19 + $0x6d] sm:$0xff] }
 0x1d5   : > { %1684 = vmatmul.f32.gmra.mxu3 %v1601_v59 }
 0x1d6   : > { %v675_v52 = vpop.f32.mrf.mxu2  ;;  %v1103_v35 = vpop.f32.mrf.mxu0 }
 0x1d7   : > { %v729_v4 = vadd.f32 %v675_v52, %v498_v51  ;;  %v1390_v51 = vld [vmem:[%s2698_s19 + $0x74] sm:$0xff] }
 0x1d8   : > { %v500_v48 = vpop.f32.mrf.mxu1  ;;  %v889_v0 = vpop.f32.mrf.mxu3 }
 0x1d9   : > { %v943_v17 = vadd.f32 %v889_v0, %v729_v4  ;;  %1898 = vmatmul.f32.gmra.mxu0 %v1815_v1  ;;  %v501_v40 = vadd.f32 %v500_v48, %v3048_v49  ;;  %v1818_v48 = vld [vmem:[%s2698_s19 + $0x76] sm:$0xff] }
 0x1db   : > { %v3415_v12 = vadd.f32 %v1103_v35, %v943_v17  ;;  %1259 = vmatmul.f32.gmra.mxu1 %v1386_v6  ;;  %1473 = vmatmul.f32.gmra.mxu2 %v1388_v24  ;;  %v1604_v35 = vld [vmem:[%s2698_s19 + $0x75] sm:$0xff] }
 0x1dd   : > { %1687 = vmatmul.f32.gmra.mxu3 %v1602_v29 }
 0x1de   : > { %v678_v62 = vpop.f32.mrf.mxu2  ;;  %v1106_v44 = vpop.f32.mrf.mxu0 }
 0x1df   : > { %v730_v9 = vadd.f32 %v678_v62, %v501_v40  ;;  %v1391_v40 = vld [vmem:[%s2698_s19 + $0x7c] sm:$0xff] }
 0x1e0   : > { %v503_v3 = vpop.f32.mrf.mxu1  ;;  %v892_v26 = vpop.f32.mrf.mxu3 }
 0x1e1   : > { %v944_v11 = vadd.f32 %v892_v26, %v730_v9  ;;  %1901 = vmatmul.f32.gmra.mxu0 %v1816_v15  ;;  %v504_v49 = vadd.f32 %v503_v3, %v3062_v57  ;;  %v1819_v3 = vld [vmem:[%s2698_s19 + $0x7e] sm:$0xff] }
 0x1e3   : > { %v3421_v33 = vadd.f32 %v1106_v44, %v944_v11  ;;  %1262 = vmatmul.f32.gmra.mxu1 %v1387_v16  ;;  %1476 = vmatmul.f32.gmra.mxu2 %v1389_v34  ;;  %v1605_v44 = vld [vmem:[%s2698_s19 + $0x7d] sm:$0xff] }
 0x1e5   : > { %1690 = vmatmul.f32.gmra.mxu3 %v1603_v42 }
 0x1e6   : > { %v681_v6 = vpop.f32.mrf.mxu2  ;;  %v1109_v21 = vpop.f32.mrf.mxu0 }
 0x1e7   : > { %v731_v50 = vadd.f32 %v681_v6, %v504_v49  ;;  %v1392_v49 = vld [vmem:[%s2698_s19 + $0x84] sm:$0xff] }
 0x1e8   : > { %v506_v37 = vpop.f32.mrf.mxu1  ;;  %v895_v59 = vpop.f32.mrf.mxu3 }
 0x1e9   : > { %v945_v52 = vadd.f32 %v895_v59, %v731_v50  ;;  %1904 = vmatmul.f32.gmra.mxu0 %v1817_v46  ;;  %v507_v57 = vadd.f32 %v506_v37, %v3079_v2  ;;  %v1820_v37 = vld [vmem:[%s2698_s19 + $0x86] sm:$0xff] }
 0x1eb   : > { %v3427_v1 = vadd.f32 %v1109_v21, %v945_v52  ;;  %1265 = vmatmul.f32.gmra.mxu1 %v1388_v24  ;;  %1479 = vmatmul.f32.gmra.mxu2 %v1390_v51  ;;  %v1606_v21 = vld [vmem:[%s2698_s19 + $0x85] sm:$0xff] }
 0x1ed   : > { %1693 = vmatmul.f32.gmra.mxu3 %v1604_v35 }
 0x1ee   : > { %v684_v16 = vpop.f32.mrf.mxu2  ;;  %v1112_v4 = vpop.f32.mrf.mxu0 }
 0x1ef   : > { %v732_v0 = vadd.f32 %v684_v16, %v507_v57  ;;  %v1393_v57 = vld [vmem:[%s2698_s19 + $0x8c] sm:$0xff] }
 0x1f0   : > { %v509_v17 = vpop.f32.mrf.mxu1  ;;  %v898_v29 = vpop.f32.mrf.mxu3 }
 0x1f1   : > { %v946_v62 = vadd.f32 %v898_v29, %v732_v0  ;;  %1907 = vmatmul.f32.gmra.mxu0 %v1818_v48  ;;  %v510_v2 = vadd.f32 %v509_v17, %v3093_v10  ;;  %v1821_v17 = vld [vmem:[%s2698_s19 + $0x8e] sm:$0xff] }
 0x1f3   : > { %v3433_v15 = vadd.f32 %v1112_v4, %v946_v62  ;;  %1268 = vmatmul.f32.gmra.mxu1 %v1389_v34  ;;  %1482 = vmatmul.f32.gmra.mxu2 %v1391_v40  ;;  %v1607_v4 = vld [vmem:[%s2698_s19 + $0x8d] sm:$0xff] }
 0x1f5   : > { %1696 = vmatmul.f32.gmra.mxu3 %v1605_v44 }
 0x1f6   : > { %v687_v24 = vpop.f32.mrf.mxu2  ;;  %v1115_v9 = vpop.f32.mrf.mxu0 }
 0x1f7   : > { %v733_v26 = vadd.f32 %v687_v24, %v510_v2  ;;  %v1394_v2 = vld [vmem:[%s2698_s19 + $0x94] sm:$0xff] }
 0x1f8   : > { %v512_v11 = vpop.f32.mrf.mxu1  ;;  %v901_v42 = vpop.f32.mrf.mxu3 }
 0x1f9   : > { %v947_v6 = vadd.f32 %v901_v42, %v733_v26  ;;  %1910 = vmatmul.f32.gmra.mxu0 %v1819_v3  ;;  %v513_v10 = vadd.f32 %v512_v11, %v3113_v20  ;;  %v1822_v11 = vld [vmem:[%s2698_s19 + $0x96] sm:$0xff] }
 0x1fb   : > { %v3439_v46 = vadd.f32 %v1115_v9, %v947_v6  ;;  %1271 = vmatmul.f32.gmra.mxu1 %v1390_v51  ;;  %1485 = vmatmul.f32.gmra.mxu2 %v1392_v49  ;;  %v1608_v9 = vld [vmem:[%s2698_s19 + $0x95] sm:$0xff] }
 0x1fd   : > { %1699 = vmatmul.f32.gmra.mxu3 %v1606_v21 }
 0x1fe   : > { %v690_v34 = vpop.f32.mrf.mxu2  ;;  %v1118_v50 = vpop.f32.mrf.mxu0 }
 0x1ff   : > { %v734_v59 = vadd.f32 %v690_v34, %v513_v10  ;;  %v1395_v10 = vld [vmem:[%s2698_s19 + $0x9c] sm:$0xff] }
 0x200   : > { %v515_v52 = vpop.f32.mrf.mxu1  ;;  %v904_v35 = vpop.f32.mrf.mxu3 }
 0x201   : > { %v948_v16 = vadd.f32 %v904_v35, %v734_v59  ;;  %1913 = vmatmul.f32.gmra.mxu0 %v1820_v37  ;;  %v516_v20 = vadd.f32 %v515_v52, %v3127_v28  ;;  %v1823_v52 = vld [vmem:[%s2698_s19 + $0x9e] sm:$0xff] }
 0x203   : > { %v3445_v48 = vadd.f32 %v1118_v50, %v948_v16  ;;  %1274 = vmatmul.f32.gmra.mxu1 %v1391_v40  ;;  %1488 = vmatmul.f32.gmra.mxu2 %v1393_v57  ;;  %v1609_v50 = vld [vmem:[%s2698_s19 + $0x9d] sm:$0xff] }
 0x205   : > { %1702 = vmatmul.f32.gmra.mxu3 %v1607_v4 }
 0x206   : > { %v693_v51 = vpop.f32.mrf.mxu2  ;;  %v1121_v0 = vpop.f32.mrf.mxu0 }
 0x207   : > { %v735_v29 = vadd.f32 %v693_v51, %v516_v20  ;;  %v1396_v20 = vld [vmem:[%s2698_s19 + $0xa4] sm:$0xff] }
 0x208   : > { %v518_v62 = vpop.f32.mrf.mxu1  ;;  %v907_v44 = vpop.f32.mrf.mxu3 }
 0x209   : > { %v949_v24 = vadd.f32 %v907_v44, %v735_v29  ;;  %1916 = vmatmul.f32.gmra.mxu0 %v1821_v17  ;;  %v519_v28 = vadd.f32 %v518_v62, %v3147_v43  ;;  %v1824_v62 = vld [vmem:[%s2698_s19 + $0xa6] sm:$0xff] }
 0x20b   : > { %v3451_v3 = vadd.f32 %v1121_v0, %v949_v24  ;;  %1277 = vmatmul.f32.gmra.mxu1 %v1392_v49  ;;  %1491 = vmatmul.f32.gmra.mxu2 %v1394_v2  ;;  %v1610_v0 = vld [vmem:[%s2698_s19 + $0xa5] sm:$0xff] }
 0x20d   : > { %1705 = vmatmul.f32.gmra.mxu3 %v1608_v9 }
 0x20e   : > { %v696_v40 = vpop.f32.mrf.mxu2  ;;  %v1124_v26 = vpop.f32.mrf.mxu0 }
 0x20f   : > { %v736_v42 = vadd.f32 %v696_v40, %v519_v28  ;;  %v1397_v28 = vld [vmem:[%s2698_s19 + $0xac] sm:$0xff] }
 0x210   : > { %v521_v6 = vpop.f32.mrf.mxu1  ;;  %v910_v21 = vpop.f32.mrf.mxu3 }
 0x211   : > { %v950_v34 = vadd.f32 %v910_v21, %v736_v42  ;;  %1919 = vmatmul.f32.gmra.mxu0 %v1822_v11  ;;  %v522_v43 = vadd.f32 %v521_v6, %v3159_v58 }
 0x213   : > { %v3457_v37 = vadd.f32 %v1124_v26, %v950_v34  ;;  %1280 = vmatmul.f32.gmra.mxu1 %v1393_v57  ;;  %1494 = vmatmul.f32.gmra.mxu2 %v1395_v10  ;;  %v3472_v26 = vld [vmem:[%s3682_s2] ss:$0 sm:$0xff]  ;;  %v1825_v34 = vld [vmem:[%s2698_s19 + $0xae] sm:$0xff] }
 0x215   : > { %1708 = vmatmul.f32.gmra.mxu3 %v1609_v50 }
 0x216   : > { %v699_v49 = vpop.f32.mrf.mxu2  ;;  %v1127_v59 = vpop.f32.mrf.mxu0 }
 0x217   : > { %v737_v35 = vadd.f32 %v699_v49, %v522_v43 }
 0x218   : > { %v913_v16 = vpop.f32.mrf.mxu3  ;;  %v1236_v4 = vpop.f32.mrf.mxu1 }
 0x219   : > { %v951_v51 = vadd.f32 %v913_v16, %v737_v35  ;;  %1922 = vmatmul.f32.gmra.mxu0 %v1823_v52  ;;  %v1344_v58 = vadd.f32 %v1236_v4, %v3176_v22  ;;  %v1398_v52 = vld [vmem:[%s2698_s19 + $0xb4] sm:$0xff] }
 0x21b   : > { %v3463_v17 = vadd.f32 %v1127_v59, %v951_v51  ;;  %1283 = vmatmul.f32.gmra.mxu1 %v1394_v2  ;;  %1497 = vmatmul.f32.gmra.mxu2 %v1396_v20  ;;  %v1611_v2 = vld [vmem:[%s2698_s19 + $0xad] sm:$0xff] }
 0x21d   : > { %1711 = vmatmul.f32.gmra.mxu3 %v1610_v0 }
 0x21e   : > { %v1450_v57 = vpop.f32.mrf.mxu2  ;;  %v1878_v29 = vpop.f32.mrf.mxu0 }
 0x21f   : > { %v1558_v44 = vadd.f32 %v1450_v57, %v1344_v58  ;;  %v1826_v57 = vld [vmem:[%s2698_s19 + $0xb6] sm:$0xff] }
 0x220   : > { %v1239_v24 = vpop.f32.mrf.mxu1  ;;  %v1664_v9 = vpop.f32.mrf.mxu3 }
 0x221   : > { %v1772_v40 = vadd.f32 %v1664_v9, %v1558_v44  ;;  %1925 = vmatmul.f32.gmra.mxu0 %v1824_v62  ;;  %v1345_v11 = vadd.f32 %v1239_v24, %v3185_v55  ;;  %v1612_v55 = vld [vmem:[%s2698_s19 + $0xb5] sm:$0xff] }
 0x222   : > { %v1399_v9 = vld [vmem:[%s2698_s19 + $0xbc] sm:$0xff] }
 0x223   : > { %v1986_v22 = vadd.f32 %v1878_v29, %v1772_v40  ;;  %1286 = vmatmul.f32.gmra.mxu1 %v1395_v10  ;;  %1500 = vmatmul.f32.gmra.mxu2 %v1397_v28 }
 0x225   : > { %v2026_v42 = vadd.f32 %v3472_v26, %v1986_v22  ;;  %1714 = vmatmul.f32.gmra.mxu3 %v1611_v2 }
 0x226   : > { %v1453_v6 = vpop.f32.mrf.mxu2  ;;  %v1881_v21 = vpop.f32.mrf.mxu0 }
 0x227   : > { %vm2062_vm0 = vcmp.ge.f32.partialorder %v2026_v42, 0.0  ;;  %v2098_v50 = vmul.f32 0.2, %v2026_v42  ;;  %v1559_v43 = vadd.f32 %v1453_v6, %v1345_v11 }
 0x228   : > { %v1242_v49 = vpop.f32.mrf.mxu1  ;;  %v1667_v59 = vpop.f32.mrf.mxu3 }
 0x229   : > { %v2134_v35 = vsel %vm2062_vm0, %v2026_v42, %v2098_v50  ;;  %v1773_v16 = vadd.f32 %v1667_v59, %v1559_v43  ;;  %1928 = vmatmul.f32.gmra.mxu0 %v1825_v34  ;;  %v1346_v4 = vadd.f32 %v1242_v49, %v3197_v13  ;;  %v1613_v13 = vld [vmem:[%s2698_s19 + $0xbd] sm:$0xff] }
 0x22a   : > { %2170 = vst [vmem:[%s3481_s30] sm:$0xff] %v2134_v35  ;;  %v1400_v59 = vld [vmem:[%s2698_s19 + $0xc4] sm:$0xff] }
 0x22b   : > { %v1987_v10 = vadd.f32 %v1881_v21, %v1773_v16  ;;  %1289 = vmatmul.f32.gmra.mxu1 %v1396_v20  ;;  %1503 = vmatmul.f32.gmra.mxu2 %v1398_v52  ;;  %v1827_v21 = vld [vmem:[%s2698_s19 + $0xbe] sm:$0xff] }
 0x22d   : > { %v2027_v51 = vadd.f32 %v3472_v26, %v1987_v10  ;;  %1717 = vmatmul.f32.gmra.mxu3 %v1612_v55 }
 0x22e   : > { %v1456_v0 = vpop.f32.mrf.mxu2  ;;  %v1884_v58 = vpop.f32.mrf.mxu0 }
 0x22f   : > { %vm2063_vm1 = vcmp.ge.f32.partialorder %v2027_v51, 0.0  ;;  %v2099_v29 = vmul.f32 0.2, %v2027_v51  ;;  %v1560_v62 = vadd.f32 %v1456_v0, %v1346_v4  ;;  %v1828_v0 = vld [vmem:[%s2698_s19 + $0xc6] sm:$0xff] }
 0x230   : > { %v1245_v44 = vpop.f32.mrf.mxu1  ;;  %v1670_v24 = vpop.f32.mrf.mxu3 }
 0x231   : > { %v2135_v40 = vsel %vm2063_vm1, %v2027_v51, %v2099_v29  ;;  %v1774_v20 = vadd.f32 %v1670_v24, %v1560_v62  ;;  %1931 = vmatmul.f32.gmra.mxu0 %v1826_v57  ;;  %v1347_v22 = vadd.f32 %v1245_v44, %v3209_v63  ;;  %v1614_v63 = vld [vmem:[%s2698_s19 + $0xc5] sm:$0xff] }
 0x232   : > { %2171 = vst [vmem:[%s3481_s30 + $0x8] sm:$0xff] %v2135_v40  ;;  %v1401_v44 = vld [vmem:[%s2698_s19 + $0xcc] sm:$0xff] }
 0x233   : > { %v1988_v2 = vadd.f32 %v1884_v58, %v1774_v20  ;;  %1292 = vmatmul.f32.gmra.mxu1 %v1397_v28  ;;  %1506 = vmatmul.f32.gmra.mxu2 %v1399_v9 }
 0x235   : > { %v2028_v11 = vadd.f32 %v3472_v26, %v1988_v2  ;;  %1720 = vmatmul.f32.gmra.mxu3 %v1613_v13 }
 0x236   : > { %v1459_v42 = vpop.f32.mrf.mxu2  ;;  %v1887_v6 = vpop.f32.mrf.mxu0 }
 0x237   : > { %vm2064_vm2 = vcmp.ge.f32.partialorder %v2028_v11, 0.0  ;;  %v2100_v34 = vmul.f32 0.2, %v2028_v11  ;;  %v1561_v50 = vadd.f32 %v1459_v42, %v1347_v22 }
 0x238   : > { %v1248_v43 = vpop.f32.mrf.mxu1  ;;  %v1673_v49 = vpop.f32.mrf.mxu3 }
 0x239   : > { %v2136_v35 = vsel %vm2064_vm2, %v2028_v11, %v2100_v34  ;;  %v1775_v28 = vadd.f32 %v1673_v49, %v1561_v50  ;;  %1934 = vmatmul.f32.gmra.mxu0 %v1827_v21  ;;  %v1348_v55 = vadd.f32 %v1248_v43, %v3218_v47  ;;  %v1615_v47 = vld [vmem:[%s2698_s19 + $0xcd] sm:$0xff] }
 0x23a   : > { %2172 = vst [vmem:[%s3481_s30 + $0x10] sm:$0xff] %v2136_v35  ;;  %v1829_v11 = vld [vmem:[%s2698_s19 + $0xce] sm:$0xff] }
 0x23b   : > { %v1989_v16 = vadd.f32 %v1887_v6, %v1775_v28  ;;  %1295 = vmatmul.f32.gmra.mxu1 %v1398_v52  ;;  %1509 = vmatmul.f32.gmra.mxu2 %v1400_v59  ;;  %v1402_v50 = vld [vmem:[%s2698_s19 + $0xd4] sm:$0xff] }
 0x23d   : > { %v2029_v10 = vadd.f32 %v3472_v26, %v1989_v16  ;;  %1723 = vmatmul.f32.gmra.mxu3 %v1614_v63 }
 0x23e   : > { %v1462_v4 = vpop.f32.mrf.mxu2  ;;  %v1890_v51 = vpop.f32.mrf.mxu0 }
 0x23f   : > { %vm2065_vm3 = vcmp.ge.f32.partialorder %v2029_v10, 0.0  ;;  %v2101_v58 = vmul.f32 0.2, %v2029_v10  ;;  %v1562_v57 = vadd.f32 %v1462_v4, %v1348_v55  ;;  %v1830_v55 = vld [vmem:[%s2698_s19 + $0xd6] sm:$0xff] }
 0x240   : > { %v1251_v29 = vpop.f32.mrf.mxu1  ;;  %v1676_v62 = vpop.f32.mrf.mxu3 }
 0x241   : > { %v2137_v24 = vsel %vm2065_vm3, %v2029_v10, %v2101_v58  ;;  %v1776_v52 = vadd.f32 %v1676_v62, %v1562_v57  ;;  %1937 = vmatmul.f32.gmra.mxu0 %v1828_v0  ;;  %v1349_v20 = vadd.f32 %v1251_v29, %v3230_v30  ;;  %v1616_v30 = vld [vmem:[%s2698_s19 + $0xd5] sm:$0xff] }
 0x242   : > { %2173 = vst [vmem:[%s3481_s30 + $0x18] sm:$0xff] %v2137_v24  ;;  %v1403_v58 = vld [vmem:[%s2698_s19 + $0xdc] sm:$0xff] }
 0x243   : > { %v1990_v40 = vadd.f32 %v1890_v51, %v1776_v52  ;;  %1298 = vmatmul.f32.gmra.mxu1 %v1399_v9  ;;  %1512 = vmatmul.f32.gmra.mxu2 %v1401_v44 }
 0x245   : > { %v2030_v13 = vadd.f32 %v3472_v26, %v1990_v40  ;;  %1726 = vmatmul.f32.gmra.mxu3 %v1615_v47  ;;  %v1831_v40 = vld [vmem:[%s2698_s19 + $0xde] sm:$0xff] }
 0x246   : > { %v1465_v2 = vpop.f32.mrf.mxu2  ;;  %v1893_v22 = vpop.f32.mrf.mxu0 }
 0x247   : > { %vm2066_vm4 = vcmp.ge.f32.partialorder %v2030_v13, 0.0  ;;  %v2102_v42 = vmul.f32 0.2, %v2030_v13  ;;  %v1563_v6 = vadd.f32 %v1465_v2, %v1349_v20 }
 0x248   : > { %v1254_v21 = vpop.f32.mrf.mxu1  ;;  %v1679_v34 = vpop.f32.mrf.mxu3 }
 0x249   : > { %v2138_v43 = vsel %vm2066_vm4, %v2030_v13, %v2102_v42  ;;  %v1777_v9 = vadd.f32 %v1679_v34, %v1563_v6  ;;  %1940 = vmatmul.f32.gmra.mxu0 %v1829_v11  ;;  %v1350_v35 = vadd.f32 %v1254_v21, %v3239_v38  ;;  %v1617_v38 = vld [vmem:[%s2698_s19 + $0xdd] sm:$0xff] }
 0x24a   : > { %2174 = vst [vmem:[%s3481_s30 + $0x20] sm:$0xff] %v2138_v43  ;;  %v1404_v11 = vld [vmem:[%s2698_s19 + $0xe4] sm:$0xff] }
 0x24b   : > { %v1991_v49 = vadd.f32 %v1893_v22, %v1777_v9  ;;  %1301 = vmatmul.f32.gmra.mxu1 %v1400_v59  ;;  %1515 = vmatmul.f32.gmra.mxu2 %v1402_v50 }
 0x24d   : > { %v2031_v28 = vadd.f32 %v3472_v26, %v1991_v49  ;;  %1729 = vmatmul.f32.gmra.mxu3 %v1616_v30  ;;  %v1832_v30 = vld [vmem:[%s2698_s19 + $0xe6] sm:$0xff] }
 0x24e   : > { %v1468_v63 = vpop.f32.mrf.mxu2  ;;  %v1896_v16 = vpop.f32.mrf.mxu0 }
 0x24f   : > { %vm2067_vm5 = vcmp.ge.f32.partialorder %v2031_v28, 0.0  ;;  %v2103_v10 = vmul.f32 0.2, %v2031_v28  ;;  %v1564_v4 = vadd.f32 %v1468_v63, %v1350_v35 }
 0x250   : > { %v1257_v51 = vpop.f32.mrf.mxu1  ;;  %v1682_v0 = vpop.f32.mrf.mxu3 }
 0x251   : > { %v2139_v57 = vsel %vm2067_vm5, %v2031_v28, %v2103_v10  ;;  %v1778_v59 = vadd.f32 %v1682_v0, %v1564_v4  ;;  %1943 = vmatmul.f32.gmra.mxu0 %v1830_v55  ;;  %v1351_v62 = vadd.f32 %v1257_v51, %v3254_v61  ;;  %v1618_v61 = vld [vmem:[%s2698_s19 + $0xe5] sm:$0xff] }
 0x252   : > { %2175 = vst [vmem:[%s3481_s30 + $0x28] sm:$0xff] %v2139_v57 }
 0x253   : > { %v1992_v29 = vadd.f32 %v1896_v16, %v1778_v59  ;;  %1304 = vmatmul.f32.gmra.mxu1 %v1401_v44  ;;  %1518 = vmatmul.f32.gmra.mxu2 %v1403_v58  ;;  %v1405_v16 = vld [vmem:[%s2698_s19 + $0xec] sm:$0xff] }
 0x254   : > { %v1833_v59 = vld [vmem:[%s2698_s19 + $0xee] sm:$0xff] }
 0x255   : > { %v2032_v24 = vadd.f32 %v3472_v26, %v1992_v29  ;;  %1732 = vmatmul.f32.gmra.mxu3 %v1617_v38 }
 0x256   : > { %v1471_v52 = vpop.f32.mrf.mxu2  ;;  %v1899_v47 = vpop.f32.mrf.mxu0 }
 0x257   : > { %vm2068_vm6 = vcmp.ge.f32.partialorder %v2032_v24, 0.0  ;;  %v2104_v20 = vmul.f32 0.2, %v2032_v24  ;;  %v1565_v13 = vadd.f32 %v1471_v52, %v1351_v62  ;;  %v1406_v52 = vld [vmem:[%s2698_s19 + $0xf4] sm:$0xff] }
 0x258   : > { %v1260_v2 = vpop.f32.mrf.mxu1  ;;  %v1685_v22 = vpop.f32.mrf.mxu3 }
 0x259   : > { %v2140_v42 = vsel %vm2068_vm6, %v2032_v24, %v2104_v20  ;;  %v1779_v44 = vadd.f32 %v1685_v22, %v1565_v13  ;;  %1946 = vmatmul.f32.gmra.mxu0 %v1831_v40  ;;  %v1352_v21 = vadd.f32 %v1260_v2, %v3263_v45  ;;  %v1619_v45 = vld [vmem:[%s2698_s19 + $0xed] sm:$0xff] }
 0x25a   : > { %2176 = vst [vmem:[%s3481_s30 + $0x30] sm:$0xff] %v2140_v42  ;;  %v1834_v42 = vld [vmem:[%s2698_s19 + $0xf6] sm:$0xff] }
 0x25b   : > { %v1993_v6 = vadd.f32 %v1899_v47, %v1779_v44  ;;  %1307 = vmatmul.f32.gmra.mxu1 %v1402_v50  ;;  %1521 = vmatmul.f32.gmra.mxu2 %v1404_v11 }
 0x25d   : > { %v2033_v34 = vadd.f32 %v3472_v26, %v1993_v6  ;;  %1735 = vmatmul.f32.gmra.mxu3 %v1618_v61 }
 0x25e   : > { %v1474_v43 = vpop.f32.mrf.mxu2  ;;  %v1902_v9 = vpop.f32.mrf.mxu0 }
 0x25f   : > { %vm2069_vm7 = vcmp.ge.f32.partialorder %v2033_v34, 0.0  ;;  %v2105_v49 = vmul.f32 0.2, %v2033_v34  ;;  %v1566_v35 = vadd.f32 %v1474_v43, %v1352_v21 }
 0x260   : > { %v1263_v28 = vpop.f32.mrf.mxu1  ;;  %v1688_v63 = vpop.f32.mrf.mxu3 }
 0x261   : > { %v2141_v55 = vsel %vm2069_vm7, %v2033_v34, %v2105_v49  ;;  %v1780_v50 = vadd.f32 %v1688_v63, %v1566_v35  ;;  %1949 = vmatmul.f32.gmra.mxu0 %v1832_v30  ;;  %v1353_v4 = vadd.f32 %v1263_v28, %v3278_v53  ;;  %v1620_v53 = vld [vmem:[%s2698_s19 + $0xf5] sm:$0xff]  ;;  %v1835_v63 = vld [vmem:[%s2698_s19 + $0xfe] sm:$0xff] }
 0x262   : > { %2177 = vst [vmem:[%s3481_s30 + $0x38] sm:$0xff] %v2141_v55  ;;  %v1407_v34 = vld [vmem:[%s2698_s19 + $0xfc] sm:$0xff] }
 0x263   : > { %v1994_v10 = vadd.f32 %v1902_v9, %v1780_v50  ;;  %1310 = vmatmul.f32.gmra.mxu1 %v1403_v58  ;;  %1524 = vmatmul.f32.gmra.mxu2 %v1405_v16 }
 0x265   : > { %v2034_v51 = vadd.f32 %v3472_v26, %v1994_v10  ;;  %1738 = vmatmul.f32.gmra.mxu3 %v1619_v45 }
 0x266   : > { %v1477_v0 = vpop.f32.mrf.mxu2  ;;  %v1905_v57 = vpop.f32.mrf.mxu0 }
 0x267   : > { %vm2070_vm8 = vcmp.ge.f32.partialorder %v2034_v51, 0.0  ;;  %v2106_v38 = vmul.f32 0.2, %v2034_v51  ;;  %v1567_v29 = vadd.f32 %v1477_v0, %v1353_v4  ;;  %v1408_v4 = vld [vmem:[%s2698_s19 + $0x104] sm:$0xff] }
 0x268   : > { %v1266_v62 = vpop.f32.mrf.mxu1  ;;  %v1691_v24 = vpop.f32.mrf.mxu3 }
 0x269   : > { %v2142_v47 = vsel %vm2070_vm8, %v2034_v51, %v2106_v38  ;;  %v1781_v58 = vadd.f32 %v1691_v24, %v1567_v29  ;;  %1952 = vmatmul.f32.gmra.mxu0 %v1833_v59  ;;  %v1354_v20 = vadd.f32 %v1266_v62, %v3287_v41  ;;  %v1621_v41 = vld [vmem:[%s2698_s19 + $0xfd] sm:$0xff]  ;;  %v1836_v62 = vld [vmem:[%s2698_s19 + $0x106] sm:$0xff] }
 0x26a   : > { %2178 = vst [vmem:[%s3481_s30 + $0x40] sm:$0xff] %v2142_v47 }
 0x26b   : > { %v1995_v40 = vadd.f32 %v1905_v57, %v1781_v58  ;;  %1313 = vmatmul.f32.gmra.mxu1 %v1404_v11  ;;  %1527 = vmatmul.f32.gmra.mxu2 %v1406_v52 }
 0x26d   : > { %v2035_v13 = vadd.f32 %v3472_v26, %v1995_v40  ;;  %1741 = vmatmul.f32.gmra.mxu3 %v1620_v53  ;;  %v1409_v40 = vld [vmem:[%s2698_s19 + $0x10c] sm:$0xff] }
 0x26e   : > { %v1480_v2 = vpop.f32.mrf.mxu2  ;;  %v1908_v22 = vpop.f32.mrf.mxu0 }
 0x26f   : > { %vm2071_vm9 = vcmp.ge.f32.partialorder %v2035_v13, 0.0  ;;  %v2107_v44 = vmul.f32 0.2, %v2035_v13  ;;  %v1568_v61 = vadd.f32 %v1480_v2, %v1354_v20 }
 0x270   : > { %v1269_v6 = vpop.f32.mrf.mxu1  ;;  %v1694_v21 = vpop.f32.mrf.mxu3 }
 0x271   : > { %v2143_v43 = vsel %vm2071_vm9, %v2035_v13, %v2107_v44  ;;  %v1782_v11 = vadd.f32 %v1694_v21, %v1568_v61  ;;  %1955 = vmatmul.f32.gmra.mxu0 %v1834_v42  ;;  %v1355_v30 = vadd.f32 %v1269_v6, %v3299_v7  ;;  %v1622_v7 = vld [vmem:[%s2698_s19 + $0x105] sm:$0xff]  ;;  %v1837_v61 = vld [vmem:[%s2698_s19 + $0x10e] sm:$0xff] }
 0x272   : > { %2179 = vst [vmem:[%s3481_s30 + $0x48] sm:$0xff] %v2143_v43 }
 0x273   : > { %v1996_v9 = vadd.f32 %v1908_v22, %v1782_v11  ;;  %1316 = vmatmul.f32.gmra.mxu1 %v1405_v16  ;;  %1530 = vmatmul.f32.gmra.mxu2 %v1407_v34 }
 0x275   : > { %v2036_v49 = vadd.f32 %v3472_v26, %v1996_v9  ;;  %1744 = vmatmul.f32.gmra.mxu3 %v1621_v41  ;;  %v1410_v41 = vld [vmem:[%s2698_s19 + $0x114] sm:$0xff] }
 0x276   : > { %v1483_v35 = vpop.f32.mrf.mxu2  ;;  %v1911_v28 = vpop.f32.mrf.mxu0 }
 0x277   : > { %vm2072_vm10 = vcmp.ge.f32.partialorder %v2036_v49, 0.0  ;;  %v2108_v55 = vmul.f32 0.2, %v2036_v49  ;;  %v1569_v50 = vadd.f32 %v1483_v35, %v1355_v30 }
 0x278   : > { %v1272_v45 = vpop.f32.mrf.mxu1  ;;  %v1697_v10 = vpop.f32.mrf.mxu3 }
 0x279   : > { %v2144_v51 = vsel %vm2072_vm10, %v2036_v49, %v2108_v55  ;;  %v1783_v16 = vadd.f32 %v1697_v10, %v1569_v50  ;;  %1958 = vmatmul.f32.gmra.mxu0 %v1835_v63  ;;  %v1356_v57 = vadd.f32 %v1272_v45, %v3311_v56  ;;  %v1623_v56 = vld [vmem:[%s2698_s19 + $0x10d] sm:$0xff]  ;;  %v1838_v55 = vld [vmem:[%s2698_s19 + $0x116] sm:$0xff] }
 0x27a   : > { %2180 = vst [vmem:[%s3481_s30 + $0x50] sm:$0xff] %v2144_v51 }
 0x27b   : > { %v1997_v0 = vadd.f32 %v1911_v28, %v1783_v16  ;;  %1319 = vmatmul.f32.gmra.mxu1 %v1406_v52  ;;  %1533 = vmatmul.f32.gmra.mxu2 %v1408_v4  ;;  %v1411_v16 = vld [vmem:[%s2698_s19 + $0x11c] sm:$0xff] }
 0x27d   : > { %v2037_v59 = vadd.f32 %v3472_v26, %v1997_v0  ;;  %1747 = vmatmul.f32.gmra.mxu3 %v1622_v7 }
 0x27e   : > { %v1486_v38 = vpop.f32.mrf.mxu2  ;;  %v1914_v29 = vpop.f32.mrf.mxu0 }
 0x27f   : > { %vm2073_vm11 = vcmp.ge.f32.partialorder %v2037_v59, 0.0  ;;  %v2109_v24 = vmul.f32 0.2, %v2037_v59  ;;  %v1570_v47 = vadd.f32 %v1486_v38, %v1356_v57 }
 0x280   : > { %v1275_v58 = vpop.f32.mrf.mxu1  ;;  %v1700_v53 = vpop.f32.mrf.mxu3 }
 0x281   : > { %v2145_v20 = vsel %vm2073_vm11, %v2037_v59, %v2109_v24  ;;  %v1784_v52 = vadd.f32 %v1700_v53, %v1570_v47  ;;  %1961 = vmatmul.f32.gmra.mxu0 %v1836_v62  ;;  %v1357_v2 = vadd.f32 %v1275_v58, %v3320_v36  ;;  %v1624_v36 = vld [vmem:[%s2698_s19 + $0x115] sm:$0xff]  ;;  %v1839_v62 = vld [vmem:[%s2698_s19 + $0x11e] sm:$0xff] }
 0x282   : > { %2181 = vst [vmem:[%s3481_s30 + $0x58] sm:$0xff] %v2145_v20  ;;  %v1412_v20 = vld [vmem:[%s2698_s19 + $0x124] sm:$0xff] }
 0x283   : > { %v1998_v13 = vadd.f32 %v1914_v29, %v1784_v52  ;;  %1322 = vmatmul.f32.gmra.mxu1 %v1407_v34  ;;  %1536 = vmatmul.f32.gmra.mxu2 %v1409_v40 }
 0x285   : > { %v2038_v22 = vadd.f32 %v3472_v26, %v1998_v13  ;;  %1750 = vmatmul.f32.gmra.mxu3 %v1623_v56 }
 0x286   : > { %v1489_v42 = vpop.f32.mrf.mxu2  ;;  %v1917_v44 = vpop.f32.mrf.mxu0 }
 0x287   : > { %vm2074_vm12 = vcmp.ge.f32.partialorder %v2038_v22, 0.0  ;;  %v2110_v6 = vmul.f32 0.2, %v2038_v22  ;;  %v1571_v21 = vadd.f32 %v1489_v42, %v1357_v2 }
 0x288   : > { %v1278_v43 = vpop.f32.mrf.mxu1  ;;  %v1703_v11 = vpop.f32.mrf.mxu3 }
 0x289   : > { %v2146_v9 = vsel %vm2074_vm12, %v2038_v22, %v2110_v6  ;;  %v1785_v34 = vadd.f32 %v1703_v11, %v1571_v21  ;;  %1964 = vmatmul.f32.gmra.mxu0 %v1837_v61  ;;  %v1358_v49 = vadd.f32 %v1278_v43, %v3332_v18  ;;  %v1625_v18 = vld [vmem:[%s2698_s19 + $0x11d] sm:$0xff]  ;;  %v1413_v11 = vld [vmem:[%s2698_s19 + $0x12c] sm:$0xff] }
 0x28a   : > { %2182 = vst [vmem:[%s3481_s30 + $0x60] sm:$0xff] %v2146_v9 }
 0x28b   : > { %v1999_v30 = vadd.f32 %v1917_v44, %v1785_v34  ;;  %1325 = vmatmul.f32.gmra.mxu1 %v1408_v4  ;;  %1539 = vmatmul.f32.gmra.mxu2 %v1410_v41  ;;  %v1840_v44 = vld [vmem:[%s2698_s19 + $0x126] sm:$0xff] }
 0x28d   : > { %v2039_v35 = vadd.f32 %v3472_v26, %v1999_v30  ;;  %1753 = vmatmul.f32.gmra.mxu3 %v1624_v36 }
 0x28e   : > { %v1492_v28 = vpop.f32.mrf.mxu2  ;;  %v1920_v63 = vpop.f32.mrf.mxu0 }
 0x28f   : > { %vm2075_vm13 = vcmp.ge.f32.partialorder %v2039_v35, 0.0  ;;  %v2111_v50 = vmul.f32 0.2, %v2039_v35  ;;  %v1572_v45 = vadd.f32 %v1492_v28, %v1358_v49  ;;  %v1841_v28 = vld [vmem:[%s2698_s19 + $0x12e] sm:$0xff] }
 0x290   : > { %v1281_v10 = vpop.f32.mrf.mxu1  ;;  %v1706_v51 = vpop.f32.mrf.mxu3 }
 0x291   : > { %v2147_v7 = vsel %vm2075_vm13, %v2039_v35, %v2111_v50  ;;  %v1786_v4 = vadd.f32 %v1706_v51, %v1572_v45  ;;  %1967 = vmatmul.f32.gmra.mxu0 %v1838_v55  ;;  %v1359_v57 = vadd.f32 %v1281_v10, %v3341_v54  ;;  %v1626_v54 = vld [vmem:[%s2698_s19 + $0x125] sm:$0xff]  ;;  %v1414_v10 = vld [vmem:[%s2698_s19 + $0x134] sm:$0xff] }
 0x292   : > { %2183 = vst [vmem:[%s3481_s30 + $0x68] sm:$0xff] %v2147_v7 }
 0x293   : > { %v2000_v0 = vadd.f32 %v1920_v63, %v1786_v4  ;;  %1328 = vmatmul.f32.gmra.mxu1 %v1409_v40  ;;  %1542 = vmatmul.f32.gmra.mxu2 %v1411_v16 }
 0x295   : > { %v2040_v59 = vadd.f32 %v3472_v26, %v2000_v0  ;;  %1756 = vmatmul.f32.gmra.mxu3 %v1625_v18 }
 0x296   : > { %v1495_v38 = vpop.f32.mrf.mxu2  ;;  %v1923_v29 = vpop.f32.mrf.mxu0 }
 0x297   : > { %vm2076_vm14 = vcmp.ge.f32.partialorder %v2040_v59, 0.0  ;;  %v2112_v24 = vmul.f32 0.2, %v2040_v59  ;;  %v1573_v47 = vadd.f32 %v1495_v38, %v1359_v57 }
 0x298   : > { %v1284_v58 = vpop.f32.mrf.mxu1  ;;  %v1709_v53 = vpop.f32.mrf.mxu3 }
 0x299   : > { %v2148_v52 = vsel %vm2076_vm14, %v2040_v59, %v2112_v24  ;;  %v1787_v40 = vadd.f32 %v1709_v53, %v1573_v47  ;;  %1970 = vmatmul.f32.gmra.mxu0 %v1839_v62  ;;  %v1360_v13 = vadd.f32 %v1284_v58, %v3347_v31  ;;  %v1627_v31 = vld [vmem:[%s2698_s19 + $0x12d] sm:$0xff]  ;;  %v1842_v59 = vld [vmem:[%s2698_s19 + $0x136] sm:$0xff] }
 0x29a   : > { %2184 = vst [vmem:[%s3481_s30 + $0x70] sm:$0xff] %v2148_v52  ;;  %v1415_v47 = vld [vmem:[%s2698_s19 + $0x13c] sm:$0xff] }
 0x29b   : > { %v2001_v56 = vadd.f32 %v1923_v29, %v1787_v40  ;;  %1331 = vmatmul.f32.gmra.mxu1 %v1410_v41  ;;  %1545 = vmatmul.f32.gmra.mxu2 %v1412_v20 }
 0x29d   : > { %v2041_v2 = vadd.f32 %v3472_v26, %v2001_v56  ;;  %1759 = vmatmul.f32.gmra.mxu3 %v1626_v54 }
 0x29e   : > { %v1498_v22 = vpop.f32.mrf.mxu2  ;;  %v1926_v42 = vpop.f32.mrf.mxu0 }
 0x29f   : > { %vm2077_vm15 = vcmp.ge.f32.partialorder %v2041_v2, 0.0  ;;  %v2113_v61 = vmul.f32 0.2, %v2041_v2  ;;  %v1574_v6 = vadd.f32 %v1498_v22, %v1360_v13  ;;  %v1843_v13 = vld [vmem:[%s2698_s19 + $0x13e] sm:$0xff] }
 0x2a0   : > { %v1287_v21 = vpop.f32.mrf.mxu1  ;;  %v1712_v43 = vpop.f32.mrf.mxu3 }
 0x2a1   : > { %v2149_v9 = vsel %vm2077_vm15, %v2041_v2, %v2113_v61  ;;  %v1788_v41 = vadd.f32 %v1712_v43, %v1574_v6  ;;  %1973 = vmatmul.f32.gmra.mxu0 %v1840_v44  ;;  %v1361_v36 = vadd.f32 %v1287_v21, %v3353_v32  ;;  %v1628_v32 = vld [vmem:[%s2698_s19 + $0x135] sm:$0xff] }
 0x2a2   : > { %2185 = vst [vmem:[%s3481_s30 + $0x78] sm:$0xff] %v2149_v9 }
 0x2a3   : > { %v2002_v34 = vadd.f32 %v1926_v42, %v1788_v41  ;;  %1334 = vmatmul.f32.gmra.mxu1 %v1411_v16  ;;  %1548 = vmatmul.f32.gmra.mxu2 %v1413_v11 }
 0x2a5   : > { %v2042_v30 = vadd.f32 %v3472_v26, %v2002_v34  ;;  %1762 = vmatmul.f32.gmra.mxu3 %v1627_v31 }
 0x2a6   : > { %v1501_v49 = vpop.f32.mrf.mxu2  ;;  %v1929_v35 = vpop.f32.mrf.mxu0 }
 0x2a7   : > { %vm2078_vm0 = vcmp.ge.f32.partialorder %v2042_v30, 0.0  ;;  %v2114_v63 = vmul.f32 0.2, %v2042_v30  ;;  %v1575_v55 = vadd.f32 %v1501_v49, %v1361_v36 }
 0x2a8   : > { %v1290_v50 = vpop.f32.mrf.mxu1  ;;  %v1715_v45 = vpop.f32.mrf.mxu3 }
 0x2a9   : > { %v2150_v51 = vsel %vm2078_vm0, %v2042_v30, %v2114_v63  ;;  %v1789_v16 = vadd.f32 %v1715_v45, %v1575_v55  ;;  %1976 = vmatmul.f32.gmra.mxu0 %v1841_v28  ;;  %v1362_v4 = vadd.f32 %v1290_v50, %v3359_v25 }
 0x2aa   : > { %2186 = vst [vmem:[%s3481_s30 + $0x80] sm:$0xff] %v2150_v51 }
 0x2ab   : > { %v2003_v7 = vadd.f32 %v1929_v35, %v1789_v16  ;;  %1337 = vmatmul.f32.gmra.mxu1 %v1412_v20  ;;  %1551 = vmatmul.f32.gmra.mxu2 %v1414_v10  ;;  %v1629_v20 = vld [vmem:[%s2698_s19 + $0x13d] sm:$0xff] }
 0x2ad   : > { %v2043_v18 = vadd.f32 %v3472_v26, %v2003_v7  ;;  %1765 = vmatmul.f32.gmra.mxu3 %v1628_v32 }
 0x2ae   : > { %v1504_v0 = vpop.f32.mrf.mxu2  ;;  %v1932_v57 = vpop.f32.mrf.mxu0 }
 0x2af   : > { %vm2079_vm1 = vcmp.ge.f32.partialorder %v2043_v18, 0.0  ;;  %v2115_v38 = vmul.f32 0.2, %v2043_v18  ;;  %v1576_v29 = vadd.f32 %v1504_v0, %v1362_v4 }
 0x2b0   : > { %v1293_v62 = vpop.f32.mrf.mxu1  ;;  %v1718_v24 = vpop.f32.mrf.mxu3 }
 0x2b1   : > { %v2151_v58 = vsel %vm2079_vm1, %v2043_v18, %v2115_v38  ;;  %v1790_v53 = vadd.f32 %v1718_v24, %v1576_v29  ;;  %1979 = vmatmul.f32.gmra.mxu0 %v1842_v59  ;;  %v1363_v52 = vadd.f32 %v1293_v62, %v3366_v14 }
 0x2b2   : > { %2187 = vst [vmem:[%s3481_s30 + $0x88] sm:$0xff] %v2151_v58 }
 0x2b3   : > { %v2004_v25 = vadd.f32 %v1932_v57, %v1790_v53  ;;  %1340 = vmatmul.f32.gmra.mxu1 %v1413_v11  ;;  %1554 = vmatmul.f32.gmra.mxu2 %v1415_v47 }
 0x2b5   : > { %v2044_v40 = vadd.f32 %v3472_v26, %v2004_v25  ;;  %1768 = vmatmul.f32.gmra.mxu3 %v1629_v20 }
 0x2b6   : > { %v1507_v54 = vpop.f32.mrf.mxu2  ;;  %v1935_v56 = vpop.f32.mrf.mxu0 }
 0x2b7   : > { %vm2080_vm2 = vcmp.ge.f32.partialorder %v2044_v40, 0.0  ;;  %v2116_v2 = vmul.f32 0.2, %v2044_v40  ;;  %v1577_v22 = vadd.f32 %v1507_v54, %v1363_v52 }
 0x2b8   : > { %v1296_v42 = vpop.f32.mrf.mxu1  ;;  %v1721_v44 = vpop.f32.mrf.mxu3 }
 0x2b9   : > { %v2152_v61 = vsel %vm2080_vm2, %v2044_v40, %v2116_v2  ;;  %v1791_v6 = vadd.f32 %v1721_v44, %v1577_v22  ;;  %1982 = vmatmul.f32.gmra.mxu0 %v1843_v13  ;;  %v1364_v43 = vadd.f32 %v1296_v42, %v3373_v39 }
 0x2ba   : > { %2188 = vst [vmem:[%s3481_s30 + $0x90] sm:$0xff] %v2152_v61 }
 0x2bb   : > { %v2005_v21 = vadd.f32 %v1935_v56, %v1791_v6 }
 0x2bd   : > { %v2045_v14 = vadd.f32 %v3472_v26, %v2005_v21 }
 0x2be   : > { %v1510_v11 = vpop.f32.mrf.mxu2  ;;  %v1938_v9 = vpop.f32.mrf.mxu0 }
 0x2bf   : > { %vm2081_vm3 = vcmp.ge.f32.partialorder %v2045_v14, 0.0  ;;  %v2117_v41 = vmul.f32 0.2, %v2045_v14  ;;  %v1578_v31 = vadd.f32 %v1510_v11, %v1364_v43 }
 0x2c0   : > { %v1299_v34 = vpop.f32.mrf.mxu1  ;;  %v1724_v36 = vpop.f32.mrf.mxu3 }
 0x2c1   : > { %v2153_v30 = vsel %vm2081_vm3, %v2045_v14, %v2117_v41  ;;  %v1792_v49 = vadd.f32 %v1724_v36, %v1578_v31  ;;  %v1365_v28 = vadd.f32 %v1299_v34, %v3379_v5 }
 0x2c2   : > { %2189 = vst [vmem:[%s3481_s30 + $0x98] sm:$0xff] %v2153_v30 }
 0x2c3   : > { %v2006_v35 = vadd.f32 %v1938_v9, %v1792_v49 }
 0x2c5   : > { %v2046_v63 = vadd.f32 %v3472_v26, %v2006_v35 }
 0x2c6   : > { %v1513_v55 = vpop.f32.mrf.mxu2  ;;  %v1941_v39 = vpop.f32.mrf.mxu0 }
 0x2c7   : > { %vm2082_vm4 = vcmp.ge.f32.partialorder %v2046_v63, 0.0  ;;  %v2118_v50 = vmul.f32 0.2, %v2046_v63  ;;  %v1579_v45 = vadd.f32 %v1513_v55, %v1365_v28 }
 0x2c8   : > { %v1302_v10 = vpop.f32.mrf.mxu1  ;;  %v1727_v51 = vpop.f32.mrf.mxu3 }
 0x2c9   : > { %v2154_v16 = vsel %vm2082_vm4, %v2046_v63, %v2118_v50  ;;  %v1793_v32 = vadd.f32 %v1727_v51, %v1579_v45  ;;  %v1366_v4 = vadd.f32 %v1302_v10, %v3385_v23 }
 0x2ca   : > { %2190 = vst [vmem:[%s3481_s30 + $0xa0] sm:$0xff] %v2154_v16 }
 0x2cb   : > { %v2007_v7 = vadd.f32 %v1941_v39, %v1793_v32 }
 0x2cd   : > { %v2047_v18 = vadd.f32 %v3472_v26, %v2007_v7 }
 0x2ce   : > { %v1516_v0 = vpop.f32.mrf.mxu2  ;;  %v1944_v5 = vpop.f32.mrf.mxu0 }
 0x2cf   : > { %vm2083_vm5 = vcmp.ge.f32.partialorder %v2047_v18, 0.0  ;;  %v2119_v57 = vmul.f32 0.2, %v2047_v18  ;;  %v1580_v59 = vadd.f32 %v1516_v0, %v1366_v4 }
 0x2d0   : > { %v1305_v38 = vpop.f32.mrf.mxu1  ;;  %v1730_v29 = vpop.f32.mrf.mxu3 }
 0x2d1   : > { %v2155_v62 = vsel %vm2083_vm5, %v2047_v18, %v2119_v57  ;;  %v1794_v24 = vadd.f32 %v1730_v29, %v1580_v59  ;;  %v1367_v58 = vadd.f32 %v1305_v38, %v3391_v19 }
 0x2d2   : > { %2191 = vst [vmem:[%s3481_s30 + $0xa8] sm:$0xff] %v2155_v62 }
 0x2d3   : > { %v2008_v47 = vadd.f32 %v1944_v5, %v1794_v24 }
 0x2d5   : > { %v2048_v53 = vadd.f32 %v3472_v26, %v2008_v47 }
 0x2d6   : > { %v1519_v20 = vpop.f32.mrf.mxu2  ;;  %v1947_v23 = vpop.f32.mrf.mxu0 }
 0x2d7   : > { %vm2084_vm6 = vcmp.ge.f32.partialorder %v2048_v53, 0.0  ;;  %v2120_v25 = vmul.f32 0.2, %v2048_v53  ;;  %v1581_v52 = vadd.f32 %v1519_v20, %v1367_v58 }
 0x2d8   : > { %v1308_v40 = vpop.f32.mrf.mxu1  ;;  %v1733_v54 = vpop.f32.mrf.mxu3 }
 0x2d9   : > { %v2156_v56 = vsel %vm2084_vm6, %v2048_v53, %v2120_v25  ;;  %v1795_v13 = vadd.f32 %v1733_v54, %v1581_v52  ;;  %v1368_v22 = vadd.f32 %v1308_v40, %v3397_v27 }
 0x2da   : > { %2192 = vst [vmem:[%s3481_s30 + $0xb0] sm:$0xff] %v2156_v56 }
 0x2db   : > { %v2009_v2 = vadd.f32 %v1947_v23, %v1795_v13 }
 0x2dd   : > { %v2049_v42 = vadd.f32 %v3472_v26, %v2009_v2 }
 0x2de   : > { %v1522_v44 = vpop.f32.mrf.mxu2  ;;  %v1950_v19 = vpop.f32.mrf.mxu0 }
 0x2df   : > { %vm2085_vm7 = vcmp.ge.f32.partialorder %v2049_v42, 0.0  ;;  %v2121_v61 = vmul.f32 0.2, %v2049_v42  ;;  %v1582_v6 = vadd.f32 %v1522_v44, %v1368_v22 }
 0x2e0   : > { %v1311_v21 = vpop.f32.mrf.mxu1  ;;  %v1736_v43 = vpop.f32.mrf.mxu3 }
 0x2e1   : > { %v2157_v14 = vsel %vm2085_vm7, %v2049_v42, %v2121_v61  ;;  %v1796_v11 = vadd.f32 %v1736_v43, %v1582_v6  ;;  %v1369_v41 = vadd.f32 %v1311_v21, %v3403_v8 }
 0x2e2   : > { %2193 = vst [vmem:[%s3481_s30 + $0xb8] sm:$0xff] %v2157_v14 }
 0x2e3   : > { %v2010_v9 = vadd.f32 %v1950_v19, %v1796_v11 }
 0x2e5   : > { %v2050_v31 = vadd.f32 %v3472_v26, %v2010_v9 }
 0x2e6   : > { %v1525_v34 = vpop.f32.mrf.mxu2  ;;  %v1953_v27 = vpop.f32.mrf.mxu0 }
 0x2e7   : > { %vm2086_vm8 = vcmp.ge.f32.partialorder %v2050_v31, 0.0  ;;  %v2122_v36 = vmul.f32 0.2, %v2050_v31  ;;  %v1583_v30 = vadd.f32 %v1525_v34, %v1369_v41 }
 0x2e8   : > { %v1314_v49 = vpop.f32.mrf.mxu1  ;;  %v1739_v35 = vpop.f32.mrf.mxu3 }
 0x2e9   : > { %v2158_v28 = vsel %vm2086_vm8, %v2050_v31, %v2122_v36  ;;  %v1797_v63 = vadd.f32 %v1739_v35, %v1583_v30  ;;  %v1370_v39 = vadd.f32 %v1314_v49, %v3409_v60 }
 0x2ea   : > { %2194 = vst [vmem:[%s3481_s30 + $0xc0] sm:$0xff] %v2158_v28 }
 0x2eb   : > { %v2011_v55 = vadd.f32 %v1953_v27, %v1797_v63 }
 0x2ed   : > { %v2051_v50 = vadd.f32 %v3472_v26, %v2011_v55 }
 0x2ee   : > { %v1528_v45 = vpop.f32.mrf.mxu2  ;;  %v1956_v8 = vpop.f32.mrf.mxu0 }
 0x2ef   : > { %vm2087_vm9 = vcmp.ge.f32.partialorder %v2051_v50, 0.0  ;;  %v2123_v10 = vmul.f32 0.2, %v2051_v50  ;;  %v1584_v51 = vadd.f32 %v1528_v45, %v1370_v39 }
 0x2f0   : > { %v1317_v16 = vpop.f32.mrf.mxu1  ;;  %v1742_v32 = vpop.f32.mrf.mxu3 }
 0x2f1   : > { %v2159_v7 = vsel %vm2087_vm9, %v2051_v50, %v2123_v10  ;;  %v1798_v4 = vadd.f32 %v1742_v32, %v1584_v51  ;;  %v1371_v0 = vadd.f32 %v1317_v16, %v3415_v12 }
 0x2f2   : > { %2195 = vst [vmem:[%s3481_s30 + $0xc8] sm:$0xff] %v2159_v7 }
 0x2f3   : > { %v2012_v18 = vadd.f32 %v1956_v8, %v1798_v4 }
 0x2f5   : > { %v2052_v5 = vadd.f32 %v3472_v26, %v2012_v18 }
 0x2f6   : > { %v1531_v57 = vpop.f32.mrf.mxu2  ;;  %v1959_v60 = vpop.f32.mrf.mxu0 }
 0x2f7   : > { %vm2088_vm10 = vcmp.ge.f32.partialorder %v2052_v5, 0.0  ;;  %v2124_v59 = vmul.f32 0.2, %v2052_v5  ;;  %v1585_v38 = vadd.f32 %v1531_v57, %v1371_v0 }
 0x2f8   : > { %v1320_v29 = vpop.f32.mrf.mxu1  ;;  %v1745_v62 = vpop.f32.mrf.mxu3 }
 0x2f9   : > { %v2160_v24 = vsel %vm2088_vm10, %v2052_v5, %v2124_v59  ;;  %v1799_v47 = vadd.f32 %v1745_v62, %v1585_v38  ;;  %v1372_v53 = vadd.f32 %v1320_v29, %v3421_v33 }
 0x2fa   : > { %2196 = vst [vmem:[%s3481_s30 + $0xd0] sm:$0xff] %v2160_v24 }
 0x2fb   : > { %v2013_v58 = vadd.f32 %v1959_v60, %v1799_v47 }
 0x2fd   : > { %v2053_v20 = vadd.f32 %v3472_v26, %v2013_v58 }
 0x2fe   : > { %v1534_v23 = vpop.f32.mrf.mxu2  ;;  %v1962_v12 = vpop.f32.mrf.mxu0 }
 0x2ff   : > { %vm2089_vm11 = vcmp.ge.f32.partialorder %v2053_v20, 0.0  ;;  %v2125_v25 = vmul.f32 0.2, %v2053_v20  ;;  %v1586_v52 = vadd.f32 %v1534_v23, %v1372_v53 }
 0x300   : > { %v1323_v40 = vpop.f32.mrf.mxu1  ;;  %v1748_v54 = vpop.f32.mrf.mxu3 }
 0x301   : > { %v2161_v56 = vsel %vm2089_vm11, %v2053_v20, %v2125_v25  ;;  %v1800_v13 = vadd.f32 %v1748_v54, %v1586_v52  ;;  %v1373_v22 = vadd.f32 %v1323_v40, %v3427_v1  ;;  %v3625_v1 = vld [vmem:[%s3682_s2] ss:$0 sm:$0xff] }
 0x302   : > { %2197 = vst [vmem:[%s3481_s30 + $0xd8] sm:$0xff] %v2161_v56 }
 0x303   : > { %v2014_v2 = vadd.f32 %v1962_v12, %v1800_v13 }
 0x305   : > { %v2054_v42 = vadd.f32 %v3472_v26, %v2014_v2 }
 0x306   : > { %v1537_v44 = vpop.f32.mrf.mxu2  ;;  %v1965_v33 = vpop.f32.mrf.mxu0 }
 0x307   : > { %vm2090_vm12 = vcmp.ge.f32.partialorder %v2054_v42, 0.0  ;;  %v2126_v19 = vmul.f32 0.2, %v2054_v42  ;;  %v1587_v61 = vadd.f32 %v1537_v44, %v1373_v22 }
 0x308   : > { %v1326_v6 = vpop.f32.mrf.mxu1  ;;  %v1751_v21 = vpop.f32.mrf.mxu3 }
 0x309   : > { %v2162_v43 = vsel %vm2090_vm12, %v2054_v42, %v2126_v19  ;;  %v1801_v14 = vadd.f32 %v1751_v21, %v1587_v61  ;;  %v1374_v9 = vadd.f32 %v1326_v6, %v3433_v15 }
 0x30a   : > { %2198 = vst [vmem:[%s3481_s30 + $0xe0] sm:$0xff] %v2162_v43 }
 0x30b   : > { %v2015_v11 = vadd.f32 %v1965_v33, %v1801_v14 }
 0x30d   : > { %v2055_v26 = vadd.f32 %v3625_v1, %v2015_v11 }
 0x30e   : > { %v1540_v41 = vpop.f32.mrf.mxu2  ;;  %v1968_v31 = vpop.f32.mrf.mxu0 }
 0x30f   : > { %vm2091_vm13 = vcmp.ge.f32.partialorder %v2055_v26, 0.0  ;;  %v2127_v34 = vmul.f32 0.2, %v2055_v26  ;;  %v1588_v27 = vadd.f32 %v1540_v41, %v1374_v9 }
 0x310   : > { %v1329_v36 = vpop.f32.mrf.mxu1  ;;  %v1754_v30 = vpop.f32.mrf.mxu3 }
 0x311   : > { %v2163_v49 = vsel %vm2091_vm13, %v2055_v26, %v2127_v34  ;;  %v1802_v35 = vadd.f32 %v1754_v30, %v1588_v27  ;;  %v1375_v15 = vadd.f32 %v1329_v36, %v3439_v46 }
 0x312   : > { %2199 = vst [vmem:[%s3481_s30 + $0xe8] sm:$0xff] %v2163_v49 }
 0x313   : > { %v2016_v28 = vadd.f32 %v1968_v31, %v1802_v35 }
 0x315   : > { %v2056_v63 = vadd.f32 %v3625_v1, %v2016_v28 }
 0x316   : > { %v1543_v55 = vpop.f32.mrf.mxu2  ;;  %v1971_v39 = vpop.f32.mrf.mxu0 }
 0x317   : > { %vm2092_vm14 = vcmp.ge.f32.partialorder %v2056_v63, 0.0  ;;  %v2128_v50 = vmul.f32 0.2, %v2056_v63  ;;  %v1589_v45 = vadd.f32 %v1543_v55, %v1375_v15 }
 0x318   : > { %v1332_v8 = vpop.f32.mrf.mxu1  ;;  %v1757_v10 = vpop.f32.mrf.mxu3 }
 0x319   : > { %v2164_v51 = vsel %vm2092_vm14, %v2056_v63, %v2128_v50  ;;  %v1803_v16 = vadd.f32 %v1757_v10, %v1589_v45  ;;  %v1376_v7 = vadd.f32 %v1332_v8, %v3445_v48 }
 0x31a   : > { %2200 = vst [vmem:[%s3481_s30 + $0xf0] sm:$0xff] %v2164_v51 }
 0x31b   : > { %v2017_v32 = vadd.f32 %v1971_v39, %v1803_v16 }
 0x31d   : > { %v2057_v4 = vadd.f32 %v3625_v1, %v2017_v32 }
 0x31e   : > { %v1546_v18 = vpop.f32.mrf.mxu2  ;;  %v1974_v46 = vpop.f32.mrf.mxu0 }
 0x31f   : > { %vm2093_vm15 = vcmp.ge.f32.partialorder %v2057_v4, 0.0  ;;  %v2129_v0 = vmul.f32 0.2, %v2057_v4  ;;  %v1590_v5 = vadd.f32 %v1546_v18, %v1376_v7 }
 0x320   : > { %v1335_v57 = vpop.f32.mrf.mxu1  ;;  %v1760_v60 = vpop.f32.mrf.mxu3 }
 0x321   : > { %v2165_v59 = vsel %vm2093_vm15, %v2057_v4, %v2129_v0  ;;  %v1804_v38 = vadd.f32 %v1760_v60, %v1590_v5  ;;  %v1377_v62 = vadd.f32 %v1335_v57, %v3451_v3 }
 0x322   : > { %2201 = vst [vmem:[%s3481_s30 + $0xf8] sm:$0xff] %v2165_v59 }
 0x323   : > { %v2018_v29 = vadd.f32 %v1974_v46, %v1804_v38 }
 0x325   : > { %v2058_v24 = vadd.f32 %v3625_v1, %v2018_v29 }
 0x326   : > { %v1549_v47 = vpop.f32.mrf.mxu2  ;;  %v1977_v48 = vpop.f32.mrf.mxu0 }
 0x327   : > { %vm2094_vm0 = vcmp.ge.f32.partialorder %v2058_v24, 0.0  ;;  %v2130_v58 = vmul.f32 0.2, %v2058_v24  ;;  %v1591_v53 = vadd.f32 %v1549_v47, %v1377_v62 }
 0x328   : > { %v1338_v20 = vpop.f32.mrf.mxu1  ;;  %v1763_v23 = vpop.f32.mrf.mxu3 }
 0x329   : > { %v2166_v12 = vsel %vm2094_vm0, %v2058_v24, %v2130_v58  ;;  %v1805_v25 = vadd.f32 %v1763_v23, %v1591_v53  ;;  %v1378_v40 = vadd.f32 %v1338_v20, %v3457_v37 }
 0x32a   : > { %2202 = vst [vmem:[%s3481_s30 + $0x100] sm:$0xff] %v2166_v12 }
 0x32b   : > { %v2019_v52 = vadd.f32 %v1977_v48, %v1805_v25 }
 0x32d   : > { %v2059_v54 = vadd.f32 %v3625_v1, %v2019_v52 }
 0x32e   : > { %v1552_v3 = vpop.f32.mrf.mxu2  ;;  %v1980_v56 = vpop.f32.mrf.mxu0 }
 0x32f   : > { %vm2095_vm1 = vcmp.ge.f32.partialorder %v2059_v54, 0.0  ;;  %v2131_v13 = vmul.f32 0.2, %v2059_v54  ;;  %v1592_v2 = vadd.f32 %v1552_v3, %v1378_v40 }
 0x330   : > { %v1766_v22 = vpop.f32.mrf.mxu3  ;;  %v1341_v33 = vpop.f32.mrf.mxu1 }
 0x331   : > { %v2167_v42 = vsel %vm2095_vm1, %v2059_v54, %v2131_v13  ;;  %v1806_v44 = vadd.f32 %v1766_v22, %v1592_v2  ;;  %v1379_v61 = vadd.f32 %v1341_v33, %v3463_v17 }
 0x332   : > { %2203 = vst [vmem:[%s3481_s30 + $0x108] sm:$0xff] %v2167_v42 }
 0x333   : > { %v2020_v19 = vadd.f32 %v1980_v56, %v1806_v44 }
 0x335   : > { %v2060_v6 = vadd.f32 %v3625_v1, %v2020_v19 }
 0x336   : > { %v1555_v37 = vpop.f32.mrf.mxu2  ;;  %v1983_v11 = vpop.f32.mrf.mxu0 }
 0x337   : > { %vm2096_vm2 = vcmp.ge.f32.partialorder %v2060_v6, 0.0  ;;  %v2132_v21 = vmul.f32 0.2, %v2060_v6  ;;  %v1593_v43 = vadd.f32 %v1555_v37, %v1379_v61 }
 0x338   : > { %v1769_v14 = vpop.f32.mrf.mxu3 }
 0x339   : > { %v2168_v9 = vsel %vm2096_vm2, %v2060_v6, %v2132_v21  ;;  %v1807_v26 = vadd.f32 %v1769_v14, %v1593_v43 }
 0x33a   : > { %2204 = vst [vmem:[%s3481_s30 + $0x110] sm:$0xff] %v2168_v9 }
 0x33b   : > { %v2021_v17 = vadd.f32 %v1983_v11, %v1807_v26 }
 0x33d   : > { %v2061_v41 = vadd.f32 %v3625_v1, %v2021_v17 }
 0x33f   : > { %vm2097_vm3 = vcmp.ge.f32.partialorder %v2061_v41, 0.0  ;;  %v2133_v31 = vmul.f32 0.2, %v2061_v41 }
 0x341   : > { %v2169_v34 = vsel %vm2097_vm3, %v2061_v41, %v2133_v31 }
 0x342   : > { %2205 = vst [vmem:[%s3481_s30 + $0x118] sm:$0xff] %v2169_v34 }
 0x343   : > { %2541 = shalt.err (!%p2538_p3)
}
 0x344   : > { %s2578_s26 = smov 128   ;;  %s2579_s29 = smov 8  }
 0x345   : > { %2471 = dma.vmem_to_hbm [thread:$0]  (%p2638_p5), %s2220_s9, 4608, %s2222_s10, %s2207_s16, %s2578_s26, %s2578_s26, %s2579_s29  }
 0x346 PF: > { %p2477_p4 = scmp.ge.s32.totalorder %s2576_s15, 2  ;;  %s2236_s30 = sand.u32 1, %s2564_s12  }
 0x347   : > { %s2237_s19 = scalar_lea.sflag [#allocation3], %s2236_s30 }
 0x348   : > { %p2474_p7 = pnand %p2477_p4, %p2642_p6 }
 0x34a   : > { %p2475_p8 = pneg %p2474_p7 }
 0x34c   : > { %2559 = dma.done.wait (%p2475_p8), %s2237_s19, 4608  }
 0x34d   : > { %2561 = vsyncadd (%p2475_p8), %s2237_s19, 4294962688  ;;  %p13_p9 = scmp.ge.s32.totalorder %s2625_s18, 4   ;;  %s3686_s12 = smov %s2568_s13 }
 0x34e   : > { %s3687_s13 = smov %s2572_s14  ;;  %s3688_s14 = smov %s2636_s21 }
 0x34f   : > { %s3689_s15 = smov %s2625_s18  ;;  %15 = sbr.rel (!%p13_p9) target bundleno = 3 (0x3), region = 75 }
 0x354   :  { %2243 = vsyncpa [#allocation3], 1 }
 0x355   :  { %2245 = vsyncpa [#allocation3 + $0x1], 1 }

</bundles_post_ra>
